<compile_context>
chip_gen: v7x
topology: tpu7x:2x2x1
jax: 0.10.0
libtpu: 0.0.40
codegen_flags: <defaults>
</compile_context>

<pallas_src>
import math

import jax
import jax.numpy as jnp
from jax.experimental import pallas as pl
from jax.experimental.pallas import tpu as pltpu


# ----------------------------------------------------------------------------
# Pallas kernel: fused q_sample + conditioned denoiser + MSE partial reduction
# grid = (B, HW // TN); each grid step handles TN tokens of one sample.
# ----------------------------------------------------------------------------
def _imagen_loss_kernel(
    alpha_ref,   # SMEM (B,)           f32   DDPM alpha(t) per sample
    sigma_ref,   # SMEM (B,)           f32   DDPM sigma(t) per sample
    bout_ref,    # SMEM (C,)           f32   output-projection bias
    x0_ref,      # VMEM (1, C, TN)     bf16  clean image tokens (channel-major)
    noise_ref,   # VMEM (1, C, TN)     bf16  gaussian noise
    cond_ref,    # VMEM (1, Dh, 1)     f32   per-sample conditioning column
    wcol_ref,    # VMEM (Dh, 128)      f32   packed weight columns
    out_ref,     # VMEM (1, 1, 1, 128) f32   lane-dense partial SSE
):
    b = pl.program_id(0)
    a = alpha_ref[b]
    s = sigma_ref[b]

    x0 = x0_ref[0].astype(jnp.float32)         # (C, TN)  f32 elementwise (v5e)
    noise = noise_ref[0].astype(jnp.float32)   # (C, TN)
    C = x0.shape[0]

    cond = cond_ref[0]                         # (Dh, 1)
    wb = wcol_ref[...]                         # (Dh, 128)

    # 1. forward diffusion (q_sample) -- per-sample scalars come from SMEM.
    x_noisy = a * x0 + s * noise               # (C, TN)

    # 2. input projection  h = W_in^T x + b_in + cond  (channel-major).
    #    K = C is tiny -> VPU broadcast-MAC, the MXU is skipped entirely.
    bias = cond + wb[:, C:C + 1]               # (Dh, 1)
    hx = wb[:, 0:1] * x_noisy[0:1, :]          # (Dh,1)*(1,TN) -> (Dh,TN)
    for c in range(1, C):                      # static loop, C is tiny
        hx = hx + wb[:, c:c + 1] * x_noisy[c:c + 1, :]
    h = jax.nn.silu(hx + bias)                 # (Dh, TN)

    # 3. output projection + eps-prediction squared error, channel by channel.
    #    N = C is tiny -> sublane reductions (VPU/XLU), no MXU.
    acc = jnp.float32(0.0)
    for c in range(C):
        w_out_c = wb[:, C + 1 + c:C + 2 + c]                     # (Dh, 1)
        pred_c = jnp.sum(h * w_out_c, axis=0, keepdims=True)     # (1, TN)
        diff = pred_c + bout_ref[c] - noise[c:c + 1, :]          # (1, TN)
        acc = acc + jnp.sum(diff * diff)

    # 4. lane-dense partial-sum writeback (reduced in the wrapper).
    out_ref[...] = jnp.broadcast_to(acc, out_ref.shape)


# ----------------------------------------------------------------------------
# Weight packing: one (Dh, 128) f32 blob of columns -> a single DMA per step.
#   column c         (c < C) : w_in[c, :]
#   column C                 : b_in
#   column C+1+c     (c < C) : w_out[:, c]
# (b_out goes to SMEM; remaining columns are zero padding)
# ----------------------------------------------------------------------------
def _pack_weight_columns(params):
    w_in = params["w_in"]            # (C, Dh)
    b_in = params["b_in"]            # (1, Dh)
    w_out = params["w_out"]          # (Dh, C)
    C, Dh = w_in.shape
    assert Dh % 128 == 0, "hidden dim must be lane-aligned (multiple of 128)"
    assert 2 * C + 1 <= 128, "too many channels for a single packed blob"
    wcol = jnp.zeros((Dh, 128), jnp.float32)
    wcol = wcol.at[:, 0:C].set(w_in.T.astype(jnp.float32))
    wcol = wcol.at[:, C].set(b_in[0].astype(jnp.float32))
    wcol = wcol.at[:, C + 1:2 * C + 1].set(w_out.astype(jnp.float32))
    return wcol


def _ddpm_loss_pallas(wcol, b_out, x0_cm, noise_cm, alpha, sigma, cond_col, *,
                      token_tile=256):
    B, C, HW = x0_cm.shape
    Dh = cond_col.shape[1]

    # token tile: must divide HW and keep the lane axis a multiple of 128
    # (full-HW fallback uses the full-dim exemption).  For v7x with B == 1,
    # pick a smaller token_tile so both TensorCores get a parallel tile.
    if HW % token_tile == 0 and token_tile % 128 == 0:
        TN = token_tile
    else:
        TN = HW
    n_tiles = HW // TN
    grid = (B, n_tiles)

    smem = pl.BlockSpec(memory_space=pltpu.MemorySpace.SMEM)
    in_specs = [
        smem,                                               # alpha  (B,)
        smem,                                               # sigma  (B,)
        smem,                                               # b_out  (C,)
        pl.BlockSpec((1, C, TN), lambda b, t: (b, 0, t)),   # x0     bf16
        pl.BlockSpec((1, C, TN), lambda b, t: (b, 0, t)),   # noise  bf16
        pl.BlockSpec((1, Dh, 1), lambda b, t: (b, 0, 0)),   # cond column
        pl.BlockSpec((Dh, 128), lambda b, t: (0, 0)),       # packed weights
    ]
    out_specs = pl.BlockSpec((1, 1, 1, 128), lambda b, t: (b, t, 0, 0))

    partial_sse = pl.pallas_call(
        _imagen_loss_kernel,
        out_shape=jax.ShapeDtypeStruct((B, n_tiles, 1, 128), jnp.float32),
        grid=grid,
        in_specs=in_specs,
        out_specs=out_specs,
        compiler_params=pltpu.CompilerParams(
            dimension_semantics=("parallel", "parallel"),
            vmem_limit_bytes=32 * 1024 * 1024,
        ),
    )(alpha, sigma, b_out, x0_cm, noise_cm, cond_col, wcol)

    # lane 0 of every (1,128) row holds the tile's partial SSE
    return jnp.sum(partial_sse[:, :, 0, 0]) / float(B * HW * C)


# ----------------------------------------------------------------------------
# JAX glue reproducing Imagen.forward ('base' unet, DDPM preconditioning)
# ----------------------------------------------------------------------------
def imagen_forward(params, x_start, text_embed, text_mask, x_lowres=None, *,
                   drop_rate, rng, token_tile=256):
    if x_lowres is not None:
        # Base model: x_lowres must be the DUMMY tensor.  Static shape check
        # only -- concretizing the traced value would break under jax.jit.
        assert x_lowres.ndim == 1 and x_lowres.shape[0] == 1, \
            "Base model should have no low-resolution conditioning"

    B, C, H, W = x_start.shape
    HW = H * W
    k_drop, k_time, k_noise = jax.random.split(rng, 3)

    # random_dropout: zero whole text embeddings per sample with prob drop_rate
    keep = jax.random.bernoulli(k_drop, 1.0 - drop_rate, (B, 1, 1))
    text_embed = text_embed.astype(jnp.float32) * keep.astype(jnp.float32)

    # continuous-time cosine DDPM schedule
    t = jax.random.uniform(k_time, (B,), dtype=jnp.float32)
    s = 0.008
    cos_term = jnp.cos((t + s) / (1.0 + s) * math.pi * 0.5)
    log_snr = -jnp.log(jnp.maximum(cos_term ** -2 - 1.0, 1e-5))
    alpha = jnp.sqrt(jax.nn.sigmoid(log_snr))        # (B,)
    sigma = jnp.sqrt(jax.nn.sigmoid(-log_snr))       # (B,)

    noise = jax.random.normal(k_noise, x_start.shape, dtype=jnp.float32)

    # channel-major token layout (B, C, H*W): H*W on the 128-lane axis, no
    # NCHW->NHWC transpose.  bf16 halves HBM->VMEM bytes of the image inputs.
    x0_cm = x_start.reshape(B, C, HW).astype(jnp.bfloat16)
    noise_cm = noise.reshape(B, C, HW).astype(jnp.bfloat16)

    # ---- per-sample conditioning (tiny M=1 matmuls; left to XLA on purpose:
    #      in-kernel they only waste MXU push/pop round-trips) ----
    F = params["temb_w1"].shape[0]
    half = F // 2
    freqs = jnp.exp(-math.log(10000.0) *
                    jnp.arange(half, dtype=jnp.float32) / half)
    ang = log_snr[:, None] * freqs[None, :]
    tfeat = jnp.concatenate([jnp.sin(ang), jnp.cos(ang)], axis=-1)      # (B,F)
    temb = jax.nn.silu(tfeat @ params["temb_w1"]) @ params["temb_w2"]   # (B,Dh)

    m = text_mask.astype(jnp.float32)                                   # (B,T)
    denom = jnp.maximum(jnp.sum(m, axis=-1, keepdims=True), 1.0)
    pooled = jnp.einsum("bt,bte->be", m, text_embed) / denom            # (B,E)
    tproj = pooled @ params["txt_w"]                                    # (B,Dh)
    cond_col = jax.nn.silu(temb + tproj)[:, :, None]                    # (B,Dh,1)

    wcol = _pack_weight_columns(params)
    b_out = params["b_out"][0].astype(jnp.float32)                      # (C,)

    loss = _ddpm_loss_pallas(wcol, b_out, x0_cm, noise_cm, alpha, sigma,
                             cond_col, token_tile=token_tile)
    return loss, {"train/loss": loss}


def init_params(key, C, E, F, Dh):
    ks = jax.random.split(key, 5)
    dense = lambda k, shape, fan_in: (
        jax.random.normal(k, shape, jnp.float32) / math.sqrt(fan_in))
    return {
        "temb_w1": dense(ks[0], (F, Dh), F),
        "temb_w2": dense(ks[1], (Dh, Dh), Dh),
        "txt_w":   dense(ks[2], (E, Dh), E),
        "w_in":    dense(ks[3], (C, Dh), C),
        "b_in":    jnp.zeros((1, Dh), jnp.float32),
        "w_out":   dense(ks[4], (Dh, C), Dh),
        "b_out":   jnp.zeros((1, C), jnp.float32),
    }


if __name__ == "__main__":
    key = jax.random.PRNGKey(0)
    B, C, H, W = 2, 4, 16, 16          # cfg.unet.image_size = 16, channels = 4
    T, E = 8, 32                       # conditioning.token_length, embed_dim
    Dh, F = 128, 32                    # lane-aligned surrogate hidden dim, time-feature dim

    k_x, k_txt, k_par, k_rng = jax.random.split(key, 4)
    x_start = jax.random.normal(k_x, (B, C, H, W), jnp.float32)
    text_embed = jax.random.normal(k_txt, (B, T, E), jnp.float32)
    text_mask = jnp.ones((B, T), jnp.int32)
    x_lowres = jnp.array([1.0], jnp.float32)   # DUMMY_TENSOR for the base model

    params = init_params(k_par, C, E, F, Dh)

    fwd = jax.jit(imagen_forward, static_argnames=("drop_rate", "token_tile"))
    loss, logs = fwd(params, x_start, text_embed, text_mask, x_lowres,
                     drop_rate=0.1, rng=k_rng, token_tile=256)
    jax.block_until_ready(loss)
    assert loss.shape == () and bool(jnp.isfinite(loss))
    print("KERNEL_OK")
</pallas_src>

<mosaic_0001>
module attributes {stable_mosaic.version = 11 : i64} {
  func.func @_imagen_loss_kernel(%arg0: i32, %arg1: i32, %arg2: memref<2xf32, #tpu.memory_space<smem>>, %arg3: memref<2xf32, #tpu.memory_space<smem>>, %arg4: memref<4xf32, #tpu.memory_space<smem>>, %arg5: memref<1x4x256xbf16, #tpu.memory_space<vmem>>, %arg6: memref<1x4x256xbf16, #tpu.memory_space<vmem>>, %arg7: memref<1x128x1xf32, #tpu.memory_space<vmem>>, %arg8: memref<128x128xf32, #tpu.memory_space<vmem>>, %arg9: memref<1x1x1x128xf32, #tpu.memory_space<vmem>>) attributes {dimension_semantics = [#tpu.dimension_semantics<parallel>, #tpu.dimension_semantics<parallel>], iteration_bounds = array<i64: 2, 1>, scalar_prefetch = 0 : i64, scratch_operands = 0 : i64, tpu.core_type = #tpu.core_type<tc>, window_params = [{transform_indices = @transform_0, window_bounds = array<i64: 2>}, {transform_indices = @transform_1, window_bounds = array<i64: 2>}, {transform_indices = @transform_2, window_bounds = array<i64: 4>}, {transform_indices = @transform_3, window_bounds = array<i64: 1, 4, 256>}, {transform_indices = @transform_4, window_bounds = array<i64: 1, 4, 256>}, {transform_indices = @transform_5, window_bounds = array<i64: 1, 128, 1>}, {pipeline_mode = #tpu.pipeline_mode<synchronous>, transform_indices = @transform_6, window_bounds = array<i64: 128, 128>}, {transform_indices = @transform_7, window_bounds = array<i64: 1, 1, 1, 128>}]} {
    %0 = arith.index_cast %arg0 : i32 to index
    %1 = memref.load %arg2[%0] : memref<2xf32, #tpu.memory_space<smem>>
    %2 = arith.index_cast %arg0 : i32 to index
    %3 = memref.load %arg3[%2] : memref<2xf32, #tpu.memory_space<smem>>
    %c0 = arith.constant 0 : index
    %c0_0 = arith.constant 0 : index
    %c0_1 = arith.constant 0 : index
    %4 = vector.load %arg5[%c0, %c0_0, %c0_1] : memref<1x4x256xbf16, #tpu.memory_space<vmem>>, vector<1x4x256xbf16>
    %5 = vector.shape_cast %4 : vector<1x4x256xbf16> to vector<4x256xbf16>
    %6 = arith.extf %5 : vector<4x256xbf16> to vector<4x256xf32>
    %c0_2 = arith.constant 0 : index
    %c0_3 = arith.constant 0 : index
    %c0_4 = arith.constant 0 : index
    %7 = vector.load %arg6[%c0_2, %c0_3, %c0_4] : memref<1x4x256xbf16, #tpu.memory_space<vmem>>, vector<1x4x256xbf16>
    %8 = vector.shape_cast %7 : vector<1x4x256xbf16> to vector<4x256xbf16>
    %9 = arith.extf %8 : vector<4x256xbf16> to vector<4x256xf32>
    %c0_5 = arith.constant 0 : index
    %c0_6 = arith.constant 0 : index
    %c0_7 = arith.constant 0 : index
    %10 = vector.load %arg7[%c0_5, %c0_6, %c0_7] : memref<1x128x1xf32, #tpu.memory_space<vmem>>, vector<1x128x1xf32>
    %11 = vector.shape_cast %10 : vector<1x128x1xf32> to vector<128x1xf32>
    %c0_8 = arith.constant 0 : index
    %c0_9 = arith.constant 0 : index
    %12 = vector.load %arg8[%c0_8, %c0_9] : memref<128x128xf32, #tpu.memory_space<vmem>>, vector<128x128xf32>
    %13 = vector.broadcast %1 : f32 to vector<4x256xf32>
    %14 = arith.mulf %13, %6 : vector<4x256xf32>
    %15 = vector.broadcast %3 : f32 to vector<4x256xf32>
    %16 = arith.mulf %15, %9 : vector<4x256xf32>
    %17 = arith.addf %14, %16 : vector<4x256xf32>
    %18 = vector.extract_strided_slice %12 {offsets = [0, 4], sizes = [128, 1], strides = [1, 1]} : vector<128x128xf32> to vector<128x1xf32>
    %19 = arith.addf %11, %18 : vector<128x1xf32>
    %20 = vector.extract_strided_slice %12 {offsets = [0, 0], sizes = [128, 1], strides = [1, 1]} : vector<128x128xf32> to vector<128x1xf32>
    %21 = vector.extract_strided_slice %17 {offsets = [0, 0], sizes = [1, 256], strides = [1, 1]} : vector<4x256xf32> to vector<1x256xf32>
    %22 = vector.broadcast %20 : vector<128x1xf32> to vector<128x256xf32>
    %23 = vector.broadcast %21 : vector<1x256xf32> to vector<128x256xf32>
    %24 = arith.mulf %22, %23 : vector<128x256xf32>
    %25 = vector.extract_strided_slice %12 {offsets = [0, 1], sizes = [128, 1], strides = [1, 1]} : vector<128x128xf32> to vector<128x1xf32>
    %26 = vector.extract_strided_slice %17 {offsets = [1, 0], sizes = [1, 256], strides = [1, 1]} : vector<4x256xf32> to vector<1x256xf32>
    %27 = vector.broadcast %25 : vector<128x1xf32> to vector<128x256xf32>
    %28 = vector.broadcast %26 : vector<1x256xf32> to vector<128x256xf32>
    %29 = arith.mulf %27, %28 : vector<128x256xf32>
    %30 = arith.addf %24, %29 : vector<128x256xf32>
    %31 = vector.extract_strided_slice %12 {offsets = [0, 2], sizes = [128, 1], strides = [1, 1]} : vector<128x128xf32> to vector<128x1xf32>
    %32 = vector.extract_strided_slice %17 {offsets = [2, 0], sizes = [1, 256], strides = [1, 1]} : vector<4x256xf32> to vector<1x256xf32>
    %33 = vector.broadcast %31 : vector<128x1xf32> to vector<128x256xf32>
    %34 = vector.broadcast %32 : vector<1x256xf32> to vector<128x256xf32>
    %35 = arith.mulf %33, %34 : vector<128x256xf32>
    %36 = arith.addf %30, %35 : vector<128x256xf32>
    %37 = vector.extract_strided_slice %12 {offsets = [0, 3], sizes = [128, 1], strides = [1, 1]} : vector<128x128xf32> to vector<128x1xf32>
    %38 = vector.extract_strided_slice %17 {offsets = [3, 0], sizes = [1, 256], strides = [1, 1]} : vector<4x256xf32> to vector<1x256xf32>
    %39 = vector.broadcast %37 : vector<128x1xf32> to vector<128x256xf32>
    %40 = vector.broadcast %38 : vector<1x256xf32> to vector<128x256xf32>
    %41 = arith.mulf %39, %40 : vector<128x256xf32>
    %42 = arith.addf %36, %41 : vector<128x256xf32>
    %43 = vector.broadcast %19 : vector<128x1xf32> to vector<128x256xf32>
    %44 = arith.addf %42, %43 : vector<128x256xf32>
    %45 = arith.negf %44 : vector<128x256xf32>
    %46 = math.exp %45 : vector<128x256xf32>
    %cst = arith.constant 1.000000e+00 : f32
    %47 = vector.broadcast %cst : f32 to vector<128x256xf32>
    %48 = arith.addf %47, %46 : vector<128x256xf32>
    %49 = arith.divf %47, %48 : vector<128x256xf32>
    %50 = arith.mulf %44, %49 : vector<128x256xf32>
    %51 = vector.extract_strided_slice %12 {offsets = [0, 5], sizes = [128, 1], strides = [1, 1]} : vector<128x128xf32> to vector<128x1xf32>
    %52 = vector.broadcast %51 : vector<128x1xf32> to vector<128x256xf32>
    %53 = arith.mulf %50, %52 : vector<128x256xf32>
    %cst_10 = arith.constant dense<0.000000e+00> : vector<256xf32>
    %54 = vector.multi_reduction <add>, %53, %cst_10 [0] : vector<128x256xf32> to vector<256xf32>
    %55 = vector.shape_cast %54 : vector<256xf32> to vector<1x256xf32>
    %c0_11 = arith.constant 0 : index
    %56 = memref.load %arg4[%c0_11] : memref<4xf32, #tpu.memory_space<smem>>
    %57 = vector.broadcast %56 : f32 to vector<1x256xf32>
    %58 = arith.addf %55, %57 : vector<1x256xf32>
    %59 = vector.extract_strided_slice %9 {offsets = [0, 0], sizes = [1, 256], strides = [1, 1]} : vector<4x256xf32> to vector<1x256xf32>
    %60 = arith.subf %58, %59 : vector<1x256xf32>
    %61 = arith.mulf %60, %60 : vector<1x256xf32>
    %62 = vector.shape_cast %61 : vector<1x256xf32> to vector<1x1x256xf32>
    %cst_12 = arith.constant dense<0.000000e+00> : vector<1xf32>
    %63 = vector.multi_reduction <add>, %62, %cst_12 [1, 2] : vector<1x1x256xf32> to vector<1xf32>
    %64 = vector.shape_cast %63 : vector<1xf32> to vector<1x1x1xf32>
    %65 = vector.extract %64[0, 0, 0] : f32 from vector<1x1x1xf32>
    %cst_13 = arith.constant 0.000000e+00 : f32
    %66 = arith.addf %cst_13, %65 : f32
    %67 = vector.extract_strided_slice %12 {offsets = [0, 6], sizes = [128, 1], strides = [1, 1]} : vector<128x128xf32> to vector<128x1xf32>
    %68 = vector.broadcast %67 : vector<128x1xf32> to vector<128x256xf32>
    %69 = arith.mulf %50, %68 : vector<128x256xf32>
    %cst_14 = arith.constant dense<0.000000e+00> : vector<256xf32>
    %70 = vector.multi_reduction <add>, %69, %cst_14 [0] : vector<128x256xf32> to vector<256xf32>
    %71 = vector.shape_cast %70 : vector<256xf32> to vector<1x256xf32>
    %c1 = arith.constant 1 : index
    %72 = memref.load %arg4[%c1] : memref<4xf32, #tpu.memory_space<smem>>
    %73 = vector.broadcast %72 : f32 to vector<1x256xf32>
    %74 = arith.addf %71, %73 : vector<1x256xf32>
    %75 = vector.extract_strided_slice %9 {offsets = [1, 0], sizes = [1, 256], strides = [1, 1]} : vector<4x256xf32> to vector<1x256xf32>
    %76 = arith.subf %74, %75 : vector<1x256xf32>
    %77 = arith.mulf %76, %76 : vector<1x256xf32>
    %78 = vector.shape_cast %77 : vector<1x256xf32> to vector<1x1x256xf32>
    %cst_15 = arith.constant dense<0.000000e+00> : vector<1xf32>
    %79 = vector.multi_reduction <add>, %78, %cst_15 [1, 2] : vector<1x1x256xf32> to vector<1xf32>
    %80 = vector.shape_cast %79 : vector<1xf32> to vector<1x1x1xf32>
    %81 = vector.extract %80[0, 0, 0] : f32 from vector<1x1x1xf32>
    %82 = arith.addf %66, %81 : f32
    %83 = vector.extract_strided_slice %12 {offsets = [0, 7], sizes = [128, 1], strides = [1, 1]} : vector<128x128xf32> to vector<128x1xf32>
    %84 = vector.broadcast %83 : vector<128x1xf32> to vector<128x256xf32>
    %85 = arith.mulf %50, %84 : vector<128x256xf32>
    %cst_16 = arith.constant dense<0.000000e+00> : vector<256xf32>
    %86 = vector.multi_reduction <add>, %85, %cst_16 [0] : vector<128x256xf32> to vector<256xf32>
    %87 = vector.shape_cast %86 : vector<256xf32> to vector<1x256xf32>
    %c2 = arith.constant 2 : index
    %88 = memref.load %arg4[%c2] : memref<4xf32, #tpu.memory_space<smem>>
    %89 = vector.broadcast %88 : f32 to vector<1x256xf32>
    %90 = arith.addf %87, %89 : vector<1x256xf32>
    %91 = vector.extract_strided_slice %9 {offsets = [2, 0], sizes = [1, 256], strides = [1, 1]} : vector<4x256xf32> to vector<1x256xf32>
    %92 = arith.subf %90, %91 : vector<1x256xf32>
    %93 = arith.mulf %92, %92 : vector<1x256xf32>
    %94 = vector.shape_cast %93 : vector<1x256xf32> to vector<1x1x256xf32>
    %cst_17 = arith.constant dense<0.000000e+00> : vector<1xf32>
    %95 = vector.multi_reduction <add>, %94, %cst_17 [1, 2] : vector<1x1x256xf32> to vector<1xf32>
    %96 = vector.shape_cast %95 : vector<1xf32> to vector<1x1x1xf32>
    %97 = vector.extract %96[0, 0, 0] : f32 from vector<1x1x1xf32>
    %98 = arith.addf %82, %97 : f32
    %99 = vector.extract_strided_slice %12 {offsets = [0, 8], sizes = [128, 1], strides = [1, 1]} : vector<128x128xf32> to vector<128x1xf32>
    %100 = vector.broadcast %99 : vector<128x1xf32> to vector<128x256xf32>
    %101 = arith.mulf %50, %100 : vector<128x256xf32>
    %cst_18 = arith.constant dense<0.000000e+00> : vector<256xf32>
    %102 = vector.multi_reduction <add>, %101, %cst_18 [0] : vector<128x256xf32> to vector<256xf32>
    %103 = vector.shape_cast %102 : vector<256xf32> to vector<1x256xf32>
    %c3 = arith.constant 3 : index
    %104 = memref.load %arg4[%c3] : memref<4xf32, #tpu.memory_space<smem>>
    %105 = vector.broadcast %104 : f32 to vector<1x256xf32>
    %106 = arith.addf %103, %105 : vector<1x256xf32>
    %107 = vector.extract_strided_slice %9 {offsets = [3, 0], sizes = [1, 256], strides = [1, 1]} : vector<4x256xf32> to vector<1x256xf32>
    %108 = arith.subf %106, %107 : vector<1x256xf32>
    %109 = arith.mulf %108, %108 : vector<1x256xf32>
    %110 = vector.shape_cast %109 : vector<1x256xf32> to vector<1x1x256xf32>
    %cst_19 = arith.constant dense<0.000000e+00> : vector<1xf32>
    %111 = vector.multi_reduction <add>, %110, %cst_19 [1, 2] : vector<1x1x256xf32> to vector<1xf32>
    %112 = vector.shape_cast %111 : vector<1xf32> to vector<1x1x1xf32>
    %113 = vector.extract %112[0, 0, 0] : f32 from vector<1x1x1xf32>
    %114 = arith.addf %98, %113 : f32
    %115 = vector.broadcast %114 : f32 to vector<1x1x1x128xf32>
    %c0_20 = arith.constant 0 : index
    %c0_21 = arith.constant 0 : index
    %c0_22 = arith.constant 0 : index
    %c0_23 = arith.constant 0 : index
    %116 = vector.load %arg9[%c0_20, %c0_21, %c0_22, %c0_23] : memref<1x1x1x128xf32, #tpu.memory_space<vmem>>, vector<1x1x1x128xf32>
    tpu.vector_store %arg9[%c0_20, %c0_21, %c0_22, %c0_23], %115 {strides = array<i32>} : memref<1x1x1x128xf32, #tpu.memory_space<vmem>>, vector<1x1x1x128xf32>,
    return
  }
  func.func @transform_0(%arg0: i32, %arg1: i32) -> i32 {
    %c0_i32 = arith.constant 0 : i32
    %c0_i32_0 = arith.constant 0 : i32
    return %c0_i32 : i32
  }
  func.func @transform_1(%arg0: i32, %arg1: i32) -> i32 {
    %c0_i32 = arith.constant 0 : i32
    %c0_i32_0 = arith.constant 0 : i32
    return %c0_i32 : i32
  }
  func.func @transform_2(%arg0: i32, %arg1: i32) -> i32 {
    %c0_i32 = arith.constant 0 : i32
    %c0_i32_0 = arith.constant 0 : i32
    return %c0_i32 : i32
  }
  func.func @transform_3(%arg0: i32, %arg1: i32) -> (i32, i32, i32) {
    %c0_i32 = arith.constant 0 : i32
    %c0_i32_0 = arith.constant 0 : i32
    return %arg0, %c0_i32, %arg1 : i32, i32, i32
  }
  func.func @transform_4(%arg0: i32, %arg1: i32) -> (i32, i32, i32) {
    %c0_i32 = arith.constant 0 : i32
    %c0_i32_0 = arith.constant 0 : i32
    return %arg0, %c0_i32, %arg1 : i32, i32, i32
  }
  func.func @transform_5(%arg0: i32, %arg1: i32) -> (i32, i32, i32) {
    %c0_i32 = arith.constant 0 : i32
    %c0_i32_0 = arith.constant 0 : i32
    %c0_i32_1 = arith.constant 0 : i32
    return %arg0, %c0_i32, %c0_i32_0 : i32, i32, i32
  }
  func.func @transform_6(%arg0: i32, %arg1: i32) -> (i32, i32) {
    %c0_i32 = arith.constant 0 : i32
    %c0_i32_0 = arith.constant 0 : i32
    %c0_i32_1 = arith.constant 0 : i32
    return %c0_i32, %c0_i32_0 : i32, i32
  }
  func.func @transform_7(%arg0: i32, %arg1: i32) -> (i32, i32, i32, i32) {
    %c0_i32 = arith.constant 0 : i32
    %c0_i32_0 = arith.constant 0 : i32
    %c0_i32_1 = arith.constant 0 : i32
    return %arg0, %arg1, %c0_i32, %c0_i32_0 : i32, i32, i32, i32
  }
}

</mosaic_0001>

<bundles_post_ra>
// kernel: imagen_forward.3
= control target key start
LH: loop header
LB: loop body
LE: loop exit
PB: predicated region body
PF: predicated region fallthrough
CT: control target
= control target key end

     0   :  { %12 = vsyncpa [#allocation3], 0  ;;  %s4261_s0 = inlined_call_operand.vmem [shape: f32[2], index: 0, kind: input, shape index: {}]   ;;  %s4262_s1 = inlined_call_operand.vmem [shape: f32[2], index: 1, kind: input, shape index: {}]   ;;  %s4263_s2 = inlined_call_operand.vmem [shape: f32[4], index: 2, kind: input, shape index: {}]   ;;  %s4264_s3 = inlined_call_operand.vmem [shape: bf16[2,4,256], index: 3, kind: input, shape index: {}]   ;;  %s4265_s4 = inlined_call_operand.vmem [shape: bf16[2,4,256], index: 4, kind: input, shape index: {}]   ;;  %s4266_s5 = inlined_call_operand.vmem [shape: f32[2,128,1], index: 5, kind: input, shape index: {}]   ;;  %s4267_s6 = inlined_call_operand.vmem [shape: f32[128,128], index: 6, kind: input, shape index: {}]   ;;  %s4268_s7 = inlined_call_operand.vmem [shape: f32[2,1,1,128], index: 7, kind: output, shape index: {}]  }
   0x1   :  { %13 = vsyncpa [#allocation5], 0  ;;  %s2674_s24 = smov 0   ;;  %s2676_s25 = smov 0  }
   0x2   :  { %s2678_s26 = smov 0  }
   0x3 LB: > { %s254_s29 = sshll.u32 %s4262_s1, 4  ;;  %s2231_s30 = sadd.s32 4294967295, %s2620_s26   ;;  %s2620_s26 = sphi %s2678_s26, %s19_s26   ;;  %s2616_s25 = sphi %s2676_s25, %s4456_s25   ;;  %s2612_s24 = sphi %s2674_s24, %s4455_s24   ;;  %s255_s29 = int_to_ptr.vmem [resolvable:$true] %s254_s29 }
   0x4   : > { %p2233_p0 = scmp.ge.s32.totalorder %s2620_s26, 1  ;;  %p230_p1 = scmp.lt.s32.totalorder %s2620_s26, 3 }
   0x5   : > { %p2695_p2 = scmp.eq.s32.totalorder %s2231_s30, 0  ;;  %s31_s10 = sadd.s32 1, %s2616_s25 }
   0x6   : > { %p2699_p3 = pnand %p2233_p0, %p230_p1  ;;  %s243_s13 = sshll.u32 %s4261_s0, 4  ;;  %s244_s13 = int_to_ptr.vmem [resolvable:$true] %s243_s13 }
   0x7   : > { %s4318_s8 = scalar_select %p2695_p2, 1, 0 }
   0x8   : > { %s4319_s9 = scalar_select %p2699_p3, 1, 0 }
   0x9   : > { %p2308_p4 = pneg %p2699_p3  ;;  %p2715_p6 = scmp.ge.s32.totalorder %s31_s10, 2 }
   0xa   : > { %s265_s18 = sshll.u32 %s4263_s2, 4  ;;  %s2545_s19 = scalar_lea.vmem %s255_s29, 16  ;;  %s266_s18 = int_to_ptr.vmem [resolvable:$true] %s265_s18 }
   0xb   : > { %p2711_p5 = pnand %p2695_p2, %p2308_p4  ;;  %p2546_p7 = scmp.ne.s32.totalorder %s255_s29, %s2545_s19 }
   0xc   : > { %p2553_p11 = scmp.lt.s32.totalorder %s255_s29, %s255_s29  ;;  %p2554_p12 = scmp.lt.s32.totalorder %s2545_s19, %s2545_s19 }
   0xd   : > { %p2547_p8 = pneg %p2711_p5 }
   0xe   : > { %p2555_p13 = por %p2554_p12, %p2553_p11 }
   0xf   : > { %p2548_p9 = pnand %p2547_p8, %p2546_p7 }
  0x11   : > { %p2549_p10 = pneg %p2548_p9 }
  0x13   : > { %p2556_p0 = pnand %p2555_p13, %p2549_p10 }
  0x15   : > { %2559 = shalt.err (!%p2556_p0)
}
  0x16   : > { %s2622_s20 = smov [#allocation4]   ;;  %s4458_s10 = smov (%p2715_p6, %s31_s10), 0 }
  0x17   : > { %2314 = dma.vmem_to_smem (!%p2711_p5), %s255_s29, 16, %s2622_s20, [#allocation5]  }
  0x18   : > { %s2560_s21 = scalar_lea.vmem %s244_s13, 16  ;;  %p2568_p9 = scmp.lt.s32.totalorder %s244_s13, %s244_s13 }
  0x19   : > { %p2561_p1 = scmp.ne.s32.totalorder %s244_s13, %s2560_s21  ;;  %p2569_p2 = scmp.lt.s32.totalorder %s2560_s21, %s2560_s21 }
  0x1b   : > { %p2563_p4 = pnand %p2561_p1, %p2547_p8  ;;  %p2570_p11 = por %p2569_p2, %p2568_p9 }
  0x1d   : > { %p2564_p7 = pneg %p2563_p4 }
  0x1f   : > { %p2571_p10 = pnand %p2570_p11, %p2564_p7 }
  0x21   : > { %2574 = shalt.err (!%p2571_p10)
}
  0x22   : > { %s2623_s22 = smov [#allocation2]   ;;  %s2575_s23 = scalar_lea.vmem %s266_s18, 16 }
  0x23   : > { %2311 = dma.vmem_to_smem (!%p2711_p5), %s244_s13, 16, %s2623_s22, [#allocation3]  }
  0x24   : > { %p2576_p6 = scmp.ne.s32.totalorder %s266_s18, %s2575_s23  ;;  %p2583_p0 = scmp.lt.s32.totalorder %s266_s18, %s266_s18 }
  0x25   : > { %p2584_p1 = scmp.lt.s32.totalorder %s2575_s23, %s2575_s23 }
  0x26   : > { %p2578_p12 = pnand %p2576_p6, %p2547_p8 }
  0x27   : > { %p2585_p4 = por %p2584_p1, %p2583_p0 }
  0x28   : > { %p2579_p13 = pneg %p2578_p12 }
  0x2a   : > { %p2586_p3 = pnand %p2585_p4, %p2579_p13 }
  0x2c   : > { %2589 = shalt.err (!%p2586_p3)
}
  0x2d   : > { %s2624_s27 = smov [#allocation6]   ;;  %p4322_p2 = scmp.ne.s32.totalorder %s4319_s9, 0 }
  0x2e   : > { %2317 = dma.vmem_to_smem (!%p2711_p5), %s266_s18, 16, %s2624_s27, [#allocation5]  }
  0x2f   : > { %315 = sbr.rel (%p4322_p2) target bundleno = 879 (0x36f), region = 48 }
  0x36   : > { %p4323_p7 = scmp.ne.s32.totalorder %s4318_s8, 0 }
  0x38   : > { %2603 = dma.done.wait (%p4323_p7), [#allocation3], 16  }
  0x39   : > { %2605 = vsyncadd (%p4323_p7), [#allocation3], 4294967280 }
  0x3a   : > { %2607 = dma.done.wait (%p4323_p7), [#allocation5], 32  }
  0x3b   : > { %2609 = vsyncadd (%p4323_p7), [#allocation5], 4294967264 }
  0x3c   : > { %329 = sfence }
  0x3d   : > { %v2756_v0 = vld [vmem:[%s4267_s6 + $0x10] sm:$0xff]  ;;  %v2761_v1 = vld [vmem:[%s4267_s6] sm:$0xff]  ;;  %s2625_s11 = smov 124   ;;  %v2770_v2 = vld [vmem:[%s4267_s6 + $0x18] sm:$0xff]  ;;  %v2626_v4 = vmov 1   ;;  %v2627_v5 = vmov 0  }
  0x3e   : > { %469 = vrot.lane.b32.xlu1 %v2756_v0, %s2625_s11  ;;  %465 = vrot.lane.b32.xlu0 %v2761_v1, %s2625_s11  ;;  %4324 = vst [vmem:[#allocation9_spill] sm:$0xff] %v2770_v2  ;;  %v2775_v3 = vld [vmem:[%s4267_s6 + $0x8] sm:$0xff]  ;;  %v2790_v7 = vld [vmem:[%s4267_s6 + $0x20] sm:$0xff]  ;;  %v2628_v18 = vmov 2   ;;  %v2629_v19 = vmov 3   ;;  %p376_p3 = scmp.lt.s32.totalorder %s2612_s24, 1 }
  0x3f   : > { %2362 = vset.pattern.permute.xlu0 %v2626_v4  ;;  %2360 = vset.pattern.permute.xlu1 %v2627_v5  ;;  %v2785_v6 = vld [vmem:[%s4267_s6 + $0x28] sm:$0xff]  ;;  %4326 = vst [vmem:[#allocation11_spill] sm:$0xff] %v2790_v7  ;;  %v2799_v8 = vld [vmem:[%s4267_s6 + $0x38] sm:$0xff]  ;;  %v2804_v9 = vld [vmem:[%s4267_s6 + $0x30] sm:$0xff]  ;;  %s406_s29 = sld [smem:[#allocation2 + %s2612_s24]]  ;;  %vm1575_vm0 = vcmask 1040384  }
  0x40   : > { %4325 = vst [vmem:[#allocation10_spill] sm:$0xff] %v2785_v6  ;;  %v2813_v10 = vld [vmem:[%s4267_s6 + $0x48] sm:$0xff]  ;;  %v2818_v11 = vld [vmem:[%s4267_s6 + $0x40] sm:$0xff]  ;;  %v2827_v12 = vld [vmem:[%s4267_s6 + $0x58] sm:$0xff]  ;;  %s407_s30 = sld [smem:[#allocation4 + %s2612_s24]] }
  0x41   : > { %v2832_v13 = vld [vmem:[%s4267_s6 + $0x50] sm:$0xff]  ;;  %v2841_v14 = vld [vmem:[%s4267_s6 + $0x68] sm:$0xff]  ;;  %v2846_v15 = vld [vmem:[%s4267_s6 + $0x60] sm:$0xff]  ;;  %s4036_s18 = sld [smem:[#allocation6]]  ;;  %s4197_s23 = sld [smem:[#allocation6 + $0x3]] }
  0x42   : > { %471 = vrot.lane.b32.xlu1 %v2770_v2, %s2625_s11  ;;  %467 = vrot.lane.b32.xlu0 %v2775_v3, %s2625_s11  ;;  %v2855_v16 = vld [vmem:[%s4267_s6 + $0x78] sm:$0xff]  ;;  %v2860_v17 = vld [vmem:[%s4267_s6 + $0x70] sm:$0xff] }
  0x46   : > { %475 = vrot.lane.b32.xlu1 %v2785_v6, %s2625_s11  ;;  %473 = vrot.lane.b32.xlu0 %v2790_v7, %s2625_s11 }
  0x4a   : > { %479 = vrot.lane.b32.xlu1 %v2799_v8, %s2625_s11  ;;  %477 = vrot.lane.b32.xlu0 %v2804_v9, %s2625_s11 }
  0x4e   : > { %483 = vrot.lane.b32.xlu1 %v2813_v10, %s2625_s11  ;;  %481 = vrot.lane.b32.xlu0 %v2818_v11, %s2625_s11 }
  0x52   : > { %487 = vrot.lane.b32.xlu1 %v2827_v12, %s2625_s11  ;;  %485 = vrot.lane.b32.xlu0 %v2832_v13, %s2625_s11 }
  0x56   : > { %491 = vrot.lane.b32.xlu1 %v2841_v14, %s2625_s11  ;;  %489 = vrot.lane.b32.xlu0 %v2846_v15, %s2625_s11 }
  0x5a   : > { %495 = vrot.lane.b32.xlu1 %v2855_v16, %s2625_s11  ;;  %493 = vrot.lane.b32.xlu0 %v2860_v17, %s2625_s11  ;;  %s2933_s11 = scalar_select %p376_p3, %s2612_s24, 1 }
  0x5c   : > { %s2287_s21 = sshll.u32 %s2933_s11, 7  ;;  %s2285_s28 = sshll.u32 %s2933_s11, 2 }
  0x5d   : > { %s2945_s27 = scalar_lea.vmem %s4266_s5, %s2287_s21  ;;  %s383_s12 = scalar_lea.vmem %s4264_s3, %s2285_s28 }
  0x5e   : > { %534 = vperm.xlu1 %2360, %v2775_v3   ;;  %649 = vperm.xlu0 %2362, %v2775_v3   ;;  %v412_v34 = vld [vmem:[%s2945_s27] sm:$0xff]  ;;  %v415_v37 = vld [vmem:[%s2945_s27 + $0x18] sm:$0xff]  ;;  %v417_v40 = vld [vmem:[%s2945_s27 + $0x28] sm:$0xff]  ;;  %s393_s15 = scalar_lea.vmem %s4265_s4, %s2285_s28  ;;  %s2281_s28 = sld [smem:[#allocation6 + $0x2]] }
  0x5f   : > { %v419_v44 = vld [vmem:[%s2945_s27 + $0x38] sm:$0xff]  ;;  %v421_v48 = vld [vmem:[%s2945_s27 + $0x48] sm:$0xff]  ;;  %v414_v55 = vld [vmem:[%s2945_s27 + $0x10] sm:$0xff]  ;;  %s405_s24 = scalar_lea.vmem %s4268_s7, %s2933_s11 }
  0x60   : > { %v413_v49 = vld [vmem:[%s2945_s27 + $0x8] sm:$0xff]  ;;  %v423_v54 = vld [vmem:[%s2945_s27 + $0x58] sm:$0xff]  ;;  %v416_v61 = vld [vmem:[%s2945_s27 + $0x20] sm:$0xff] }
  0x61   : > { %v425_v60 = vld [vmem:[%s2945_s27 + $0x68] sm:$0xff] }
  0x62   : > { %538 = vperm.xlu1 %2360, %v2756_v0   ;;  %661 = vperm.xlu0 %2362, %v2790_v7  }
  0x66   : > { %546 = vperm.xlu1 %2360, %v2790_v7   ;;  %669 = vperm.xlu0 %2362, %v2804_v9  }
  0x6a   : > { %554 = vperm.xlu1 %2360, %v2804_v9   ;;  %677 = vperm.xlu0 %2362, %v2818_v11  }
  0x6e   : > { %562 = vperm.xlu1 %2360, %v2818_v11   ;;  %685 = vperm.xlu0 %2362, %v2832_v13  }
  0x72   : > { %570 = vperm.xlu1 %2360, %v2832_v13   ;;  %693 = vperm.xlu0 %2362, %v2846_v15  }
  0x76   : > { %578 = vperm.xlu1 %2360, %v2846_v15   ;;  %701 = vperm.xlu0 %2362, %v2860_v17  }
  0x7a   : > { %586 = vperm.xlu1 %2360, %v2860_v17   ;;  %2363 = vset.pattern.permute.xlu0 %v2628_v18 }
  0x7b   : > { %791 = vperm.xlu0 %2363, %v2761_v1  }
  0x7e   : > { %2361 = vset.pattern.permute.xlu1 %v2626_v4 }
  0x7f   : > { %645 = vperm.xlu1 %2361, %v2761_v1   ;;  %803 = vperm.xlu0 %2363, %v2770_v2  }
  0x83   : > { %653 = vperm.xlu1 %2361, %v2756_v0   ;;  %811 = vperm.xlu0 %2363, %v2785_v6  }
  0x87   : > { %657 = vperm.xlu1 %2361, %v2770_v2   ;;  %819 = vperm.xlu0 %2363, %v2799_v8  }
  0x8b   : > { %665 = vperm.xlu1 %2361, %v2785_v6   ;;  %827 = vperm.xlu0 %2363, %v2813_v10  }
  0x8f   : > { %673 = vperm.xlu1 %2361, %v2799_v8   ;;  %835 = vperm.xlu0 %2363, %v2827_v12  }
  0x93   : > { %681 = vperm.xlu1 %2361, %v2813_v10   ;;  %843 = vperm.xlu0 %2363, %v2841_v14  }
  0x97   : > { %689 = vperm.xlu1 %2361, %v2827_v12   ;;  %851 = vperm.xlu0 %2363, %v2855_v16  }
  0x9b   : > { %697 = vperm.xlu1 %2361, %v2841_v14   ;;  %2366 = vset.pattern.permute.xlu0 %v2629_v19 }
  0x9c   : > { %941 = vperm.xlu0 %2366, %v2775_v3  }
  0x9f   : > { %705 = vperm.xlu1 %2361, %v2855_v16  }
  0xa0   : > { %953 = vperm.xlu0 %2366, %v2790_v7  }
  0xa3   : > { %2364 = vset.pattern.permute.xlu1 %v2628_v18  ;;  %v427_v18 = vld [vmem:[%s2945_s27 + $0x78] sm:$0xff] }
  0xa4   : > { %795 = vperm.xlu1 %2364, %v2775_v3   ;;  %961 = vperm.xlu0 %2366, %v2804_v9  }
  0xa8   : > { %799 = vperm.xlu1 %2364, %v2756_v0   ;;  %969 = vperm.xlu0 %2366, %v2818_v11  }
  0xac   : > { %807 = vperm.xlu1 %2364, %v2790_v7   ;;  %977 = vperm.xlu0 %2366, %v2832_v13  }
  0xb0   : > { %v2906_v20 = vpop.permute.xlu1 %469  ;;  %815 = vperm.xlu1 %2364, %v2804_v9   ;;  %985 = vperm.xlu0 %2366, %v2846_v15   ;;  %v466_v21 = vpop.permute.xlu0 %465 }
  0xb1   : > { %v513_v35 = vadd.f32 %v466_v21, %v412_v34  ;;  %v515_v59 = vadd.f32 %v2906_v20, %v414_v55  ;;  %v2630_v34 = vmov 5   ;;  %v4276_v55 = vmov 7  }
  0xb4   : > { %823 = vperm.xlu1 %2364, %v2818_v11   ;;  %993 = vperm.xlu0 %2366, %v2860_v17   ;;  %v468_v22 = vpop.permute.xlu0 %467  ;;  %v472_v23 = vpop.permute.xlu1 %471 }
  0xb5   : > { %v516_v39 = vadd.f32 %v472_v23, %v415_v37  ;;  %v514_v53 = vadd.f32 %v468_v22, %v413_v49  ;;  %v424_v37 = vld [vmem:[%s2945_s27 + $0x60] sm:$0xff] }
  0xb8   : > { %831 = vperm.xlu1 %2364, %v2832_v13   ;;  %2367 = vset.pattern.permute.xlu0 %v2627_v5  ;;  %v2915_v24 = vpop.permute.xlu0 %473  ;;  %v476_v25 = vpop.permute.xlu1 %475 }
  0xb9   : > { %530 = vperm.xlu0 %2367, %v2761_v1   ;;  %v518_v43 = vadd.f32 %v476_v25, %v417_v40  ;;  %v420_v25 = vld [vmem:[%s2945_s27 + $0x40] sm:$0xff]  ;;  %v426_v40 = vld [vmem:[%s2945_s27 + $0x70] sm:$0xff] }
  0xbc   : > { %839 = vperm.xlu1 %2364, %v2846_v15   ;;  %v2919_v26 = vpop.permute.xlu0 %477  ;;  %v480_v27 = vpop.permute.xlu1 %479 }
  0xbd   : > { %542 = vperm.xlu0 %2367, %v2770_v2   ;;  %v520_v47 = vadd.f32 %v480_v27, %v419_v44 }
  0xc0   : > { %847 = vperm.xlu1 %2364, %v2860_v17   ;;  %v2925_v28 = vpop.permute.xlu0 %481  ;;  %v484_v29 = vpop.permute.xlu1 %483 }
  0xc1   : > { %550 = vperm.xlu0 %2367, %v2785_v6   ;;  %v522_v52 = vadd.f32 %v484_v29, %v421_v48 }
  0xc4   : > { %2365 = vset.pattern.permute.xlu1 %v2629_v19  ;;  %v2930_v30 = vpop.permute.xlu0 %485  ;;  %v488_v31 = vpop.permute.xlu1 %487  ;;  %v418_v19 = vld [vmem:[%s2945_s27 + $0x30] sm:$0xff] }
  0xc5   : > { %937 = vperm.xlu1 %2365, %v2761_v1   ;;  %558 = vperm.xlu0 %2367, %v2799_v8   ;;  %v524_v58 = vadd.f32 %v488_v31, %v423_v54  ;;  %v519_v23 = vadd.f32 %v2919_v26, %v418_v19  ;;  %v422_v31 = vld [vmem:[%s2945_s27 + $0x50] sm:$0xff]  ;;  %s4215_s27 = sld [smem:[#allocation6 + $0x1]] }
  0xc6   : > { %v523_v26 = vadd.f32 %v2930_v30, %v422_v31 }
  0xc8   : > { %v2940_v32 = vpop.permute.xlu0 %489  ;;  %v492_v33 = vpop.permute.xlu1 %491 }
  0xc9   : > { %945 = vperm.xlu1 %2365, %v2756_v0   ;;  %566 = vperm.xlu0 %2367, %v2813_v10   ;;  %v526_v4 = vadd.f32 %v492_v33, %v425_v60  ;;  %v4272_v60 = vmov 8  }
  0xcc   : > { %v2950_v36 = vpop.permute.xlu0 %493  ;;  %v496_v38 = vpop.permute.xlu1 %495 }
  0xcd   : > { %949 = vperm.xlu1 %2365, %v2770_v2   ;;  %574 = vperm.xlu0 %2367, %v2827_v12   ;;  %v528_v20 = vadd.f32 %v496_v38, %v427_v18  ;;  %v527_v30 = vadd.f32 %v2950_v36, %v426_v40 }
  0xd1   : > { %957 = vperm.xlu1 %2365, %v2785_v6   ;;  %582 = vperm.xlu0 %2367, %v2841_v14  }
  0xd5   : > { %965 = vperm.xlu1 %2365, %v2799_v8   ;;  %590 = vperm.xlu0 %2367, %v2855_v16  }
  0xd9   : > { %973 = vperm.xlu1 %2365, %v2813_v10   ;;  %1084 = vperm.xlu0 %2367, %v513_v35  }
  0xdd   : > { %v2955_v41 = vpop.permute.xlu1 %534  ;;  %981 = vperm.xlu1 %2365, %v2827_v12   ;;  %v2958_v42 = vpop.permute.xlu0 %649  ;;  %1099 = vperm.xlu0 %2367, %v516_v39  }
  0xe1   : > { %v2961_v45 = vpop.permute.xlu1 %538  ;;  %989 = vperm.xlu1 %2365, %v2841_v14   ;;  %v2964_v46 = vpop.permute.xlu0 %661  ;;  %1109 = vperm.xlu0 %2367, %v518_v43  }
  0xe5   : > { %v2968_v50 = vpop.permute.xlu1 %546  ;;  %997 = vperm.xlu1 %2365, %v2855_v16   ;;  %v2971_v51 = vpop.permute.xlu0 %669  ;;  %1119 = vperm.xlu0 %2367, %v520_v47  }
  0xe9   : > { %v2975_v56 = vpop.permute.xlu1 %554  ;;  %2368 = vset.pattern.permute.xlu1 %v2627_v5  ;;  %v2978_v57 = vpop.permute.xlu0 %677  ;;  %1129 = vperm.xlu0 %2367, %v522_v52   ;;  %v517_v5 = vadd.f32 %v2915_v24, %v416_v61  ;;  %v521_v24 = vadd.f32 %v2925_v28, %v420_v25  ;;  %v525_v28 = vadd.f32 %v2940_v32, %v424_v37  ;;  %v594_v61 = vlaneseq }
  0xea   : > { %1089 = vperm.xlu1 %2368, %v514_v53  }
  0xed   : > { %v2983_v62 = vpop.permute.xlu1 %562  ;;  %v2985_v63 = vpop.permute.xlu0 %685  ;;  %1139 = vperm.xlu0 %2367, %v524_v58  }
  0xee   : > { %1094 = vperm.xlu1 %2368, %v515_v59  }
  0xf1   : > { %v2990_v21 = vpop.permute.xlu1 %570  ;;  %v2992_v22 = vpop.permute.xlu0 %693  ;;  %1149 = vperm.xlu0 %2367, %v526_v4  }
  0xf2   : > { %1104 = vperm.xlu1 %2368, %v517_v5  }
  0xf5   : > { %v2996_v27 = vpop.permute.xlu1 %578  ;;  %v2998_v29 = vpop.permute.xlu0 %701  ;;  %1159 = vperm.xlu0 %2367, %v528_v20   ;;  %v444_v20 = vstv %s406_s29 }
  0xf6   : > { %1114 = vperm.xlu1 %2368, %v519_v23   ;;  %v446_v23 = vstv %s407_s30 }
  0xf9   : > { %v3002_v33 = vpop.permute.xlu1 %586  ;;  %2370 = vset.pattern.permute.xlu0 %v2630_v34 }
  0xfa   : > { %v3004_v35 = vpop.permute.xlu0 %791  ;;  %1124 = vperm.xlu1 %2368, %v521_v24   ;;  %1423 = vperm.xlu0 %2370, %v2775_v3  }
  0xfe   : > { %v3009_v38 = vpop.permute.xlu1 %645  ;;  %v3011_v39 = vpop.permute.xlu0 %803  ;;  %1134 = vperm.xlu1 %2368, %v523_v26   ;;  %1435 = vperm.xlu0 %2370, %v2790_v7  }
 0x102   : > { %v3016_v43 = vpop.permute.xlu1 %653  ;;  %v3018_v44 = vpop.permute.xlu0 %811  ;;  %1144 = vperm.xlu1 %2368, %v525_v28   ;;  %1443 = vperm.xlu0 %2370, %v2804_v9  }
 0x106   : > { %v3022_v47 = vpop.permute.xlu1 %657  ;;  %v3024_v48 = vpop.permute.xlu0 %819  ;;  %1154 = vperm.xlu1 %2368, %v527_v30   ;;  %1451 = vperm.xlu0 %2370, %v2818_v11  }
 0x10a   : > { %v3027_v49 = vpop.permute.xlu1 %665  ;;  %v3029_v32 = vpop.permute.xlu0 %827  ;;  %2369 = vset.pattern.permute.xlu1 %v2630_v34  ;;  %1459 = vperm.xlu0 %2370, %v2832_v13  }
 0x10b   : > { %1419 = vperm.xlu1 %2369, %v2761_v1  }
 0x10e   : > { %v3033_v9 = vpop.permute.xlu1 %673  ;;  %v3035_v36 = vpop.permute.xlu0 %835  ;;  %1467 = vperm.xlu0 %2370, %v2846_v15  }
 0x10f   : > { %1427 = vperm.xlu1 %2369, %v2756_v0  }
 0x112   : > { %v3039_v52 = vpop.permute.xlu1 %681  ;;  %v3041_v53 = vpop.permute.xlu0 %843  ;;  %1475 = vperm.xlu0 %2370, %v2860_v17  }
 0x113   : > { %1431 = vperm.xlu1 %2369, %v2770_v2  }
 0x116   : > { %v3045_v13 = vpop.permute.xlu1 %689  ;;  %v3047_v54 = vpop.permute.xlu0 %851  ;;  %2385 = vset.pattern.permute.xlu0 %v4276_v55 }
 0x117   : > { %1439 = vperm.xlu1 %2369, %v2785_v6   ;;  %1787 = vperm.xlu0 %2385, %v2799_v8  }
 0x11a   : > { %v3052_v15 = vpop.permute.xlu1 %697 }
 0x11b   : > { %v3055_v58 = vpop.permute.xlu0 %941  ;;  %1447 = vperm.xlu1 %2369, %v2799_v8   ;;  %1791 = vperm.xlu0 %2385, %v2818_v11   ;;  %v408_v8 = vld [vmem:[%s383_s12] sm:$0xf] }
 0x11c   : > { %v410_v11 = vld [vmem:[%s393_s15] sm:$0xf]  ;;  %v409_v18 = vunpack.c.l.bf16 %v408_v8 }
 0x11d   : > { %v3079_v19 = vunpack.c.l.bf16 %v410_v11 }
 0x11e   : > { %v3067_v17 = vpop.permute.xlu1 %705  ;;  %v445_v31 = vmul.f32 %v444_v20, %v409_v18 }
 0x11f   : > { %v3069_v59 = vpop.permute.xlu0 %953  ;;  %1455 = vperm.xlu1 %2369, %v2813_v10   ;;  %2388 = vset.pattern.permute.xlu0 %v4272_v60  ;;  %4328 = vst [vmem:[#allocation13_spill] sm:$0xff] %v3079_v19  ;;  %v3082_v10 = vshrl.u32 %v594_v61, 7  ;;  %v447_v34 = vmul.f32 %v446_v23, %v3079_v19  ;;  %v4274_v61 = vmov 6  }
 0x120   : > { %1928 = vperm.xlu0 %2388, %v2761_v1  }
 0x121   : > { %4329 = vst [vmem:[#allocation14_spill] sm:$0xff] %v3082_v10  ;;  %v4278_v26 = vsub.s32 4, %v3082_v10  ;;  %v448_v40 = vadd.f32 %v447_v34, %v445_v31  ;;  %v3100_v30 = vsub.s32 1, %v3082_v10  ;;  %v3116_v31 = vsub.s32 2, %v3082_v10 }
 0x122   : > { %v3120_v60 = vsub.s32 3, %v3082_v10 }
 0x123   : > { %v3074_v4 = vpop.permute.xlu1 %795  ;;  %v3076_v5 = vpop.permute.xlu0 %961  ;;  %1463 = vperm.xlu1 %2369, %v2827_v12   ;;  %v3091_v12 = vsub.s32 0, %v3082_v10  ;;  %4335 = vst [vmem:[#allocation20_spill] sm:$0xff] %v3100_v30  ;;  %v601_v20 = vrot.slane %v448_v40, %v4278_v26  ;;  %4338 = vst [vmem:[#allocation23_spill] sm:$0xff] %v3116_v31 }
 0x124   : > { %4327 = vst [vmem:[#allocation12_spill] sm:$0xff] %v3076_v5  ;;  %1948 = vperm.xlu0 %2388, %v2785_v6   ;;  %4339 = vst [vmem:[#allocation24_spill] sm:$0xff] %v3120_v60 }
 0x125   : > { %4332 = vst [vmem:[#allocation17_spill] sm:$0xff] %v3091_v12  ;;  %v597_v18 = vrot.slane %v448_v40, %v3091_v12 }
 0x127   : > { %v3084_v25 = vpop.permute.xlu1 %799  ;;  %v3086_v24 = vpop.permute.xlu0 %969  ;;  %1471 = vperm.xlu1 %2369, %v2841_v14   ;;  %v4281_v14 = vsub.s32 5, %v3082_v10  ;;  %v3128_v19 = vrot.slane %v597_v18, %v3091_v12  ;;  %v4343_v18 = vsub.s32 7, %v3082_v10 }
 0x128   : > { %4330 = vst [vmem:[#allocation15_spill] sm:$0xff] %v3084_v25  ;;  %4331 = vst [vmem:[#allocation16_spill] sm:$0xff] %v3086_v24 }
 0x129   : > { %v715_v23 = vrot.slane %v448_v40, %v4281_v14  ;;  %v3131_v14 = vrot.slane %v601_v20, %v3091_v12 }
 0x12b   : > { %v3094_v37 = vpop.permute.xlu1 %807  ;;  %v3096_v28 = vpop.permute.xlu0 %977  ;;  %1479 = vperm.xlu1 %2369, %v2855_v16   ;;  %v711_v16 = vrot.slane %v448_v40, %v3100_v30  ;;  %v3137_v34 = vrot.slane %v715_v23, %v3100_v30  ;;  %v615_v23 = vmul.f32 %v3131_v14, %v2955_v41 }
 0x12c   : > { %4333 = vst [vmem:[#allocation18_spill] sm:$0xff] %v3094_v37  ;;  %4334 = vst [vmem:[#allocation19_spill] sm:$0xff] %v3096_v28  ;;  %v621_v28 = vmul.f32 %v3131_v14, %v2968_v50  ;;  %v624_v37 = vmul.f32 %v3128_v19, %v2975_v56 }
 0x12d   : > { %v3134_v6 = vrot.slane %v711_v16, %v3100_v30  ;;  %v614_v16 = vmul.f32 %v3128_v19, %v2955_v41  ;;  %v729_v12 = vmul.f32 %v3137_v34, %v2958_v42 }
 0x12f   : > { %v3103_v8 = vpop.permute.xlu1 %815  ;;  %v3105_v11 = vpop.permute.xlu0 %985  ;;  %2371 = vset.pattern.permute.xlu1 %v4274_v61  ;;  %v857_v61 = vrot.slane %v448_v40, %v3116_v31  ;;  %v728_v30 = vmul.f32 %v3134_v6, %v2958_v42  ;;  %v620_v42 = vmul.f32 %v3128_v19, %v2968_v50  ;;  %v739_v50 = vmul.f32 %v3137_v34, %v2971_v51 }
 0x130   : > { %4336 = vst [vmem:[#allocation21_spill] sm:$0xff] %v3103_v8  ;;  %4337 = vst [vmem:[#allocation22_spill] sm:$0xff] %v3105_v11  ;;  %1590 = vperm.xlu1 %2371, %v2761_v1   ;;  %v1007_v8 = vrot.slane %v448_v40, %v4343_v18  ;;  %v734_v18 = vmul.f32 %v3134_v6, %v2964_v46 }
 0x133   : > { %v3123_v55 = vpop.permute.xlu1 %823  ;;  %v3125_v26 = vpop.permute.xlu0 %993 }
 0x134   : > { %4340 = vst [vmem:[#allocation25_spill] sm:$0xff] %v3123_v55  ;;  %4341 = vst [vmem:[#allocation26_spill] sm:$0xff] %v3125_v26  ;;  %1594 = vperm.xlu1 %2371, %v2775_v3   ;;  %v4342_v55 = vsub.s32 6, %v3082_v10  ;;  %v1003_v26 = vrot.slane %v448_v40, %v3120_v60  ;;  %v735_v10 = vmul.f32 %v3137_v34, %v2964_v46 }
 0x135   : > { %v3182_v46 = vadd.f32 %v728_v30, %v614_v16  ;;  %v628_v30 = vmul.f32 %v3128_v19, %v2983_v62  ;;  %v629_v16 = vmul.f32 %v3131_v14, %v2983_v62  ;;  %v633_v62 = vmul.f32 %v3131_v14, %v2990_v21 }
 0x136   : > { %v861_v11 = vrot.slane %v448_v40, %v4342_v55  ;;  %v3160_v40 = vrot.slane %v857_v61, %v3116_v31  ;;  %v738_v61 = vmul.f32 %v3134_v6, %v2971_v51  ;;  %v632_v51 = vmul.f32 %v3128_v19, %v2990_v21 }
 0x137   : > { %v3146_v20 = vpop.permute.xlu1 %831  ;;  %v641_v21 = vmul.f32 %v3131_v14, %v3002_v33 }
 0x138   : > { %4344 = vst [vmem:[#allocation27_spill] sm:$0xff] %v3146_v20  ;;  %v3156_v55 = vpop.permute.xlu0 %530  ;;  %1598 = vperm.xlu1 %2371, %v2756_v0   ;;  %v3167_v41 = vrot.slane %v861_v11, %v3116_v31  ;;  %v3170_v20 = vrot.slane %v1003_v26, %v3120_v60  ;;  %v3184_v11 = vadd.f32 %v729_v12, %v615_v23 }
 0x139   : > { %v616_v26 = vmul.f32 %v3128_v19, %v2961_v45  ;;  %v3189_v31 = vrot.slane %v1007_v8, %v3120_v60  ;;  %v742_v12 = vmul.f32 %v3134_v6, %v2978_v57  ;;  %v743_v8 = vmul.f32 %v3137_v34, %v2978_v57 }
 0x13a   : > { %4346 = vst [vmem:[#allocation29_spill] sm:$0xff] %v3184_v11  ;;  %v746_v23 = vmul.f32 %v3134_v6, %v2985_v63  ;;  %v3212_v60 = vadd.f32 %v734_v18, %v620_v42  ;;  %v747_v57 = vmul.f32 %v3137_v34, %v2985_v63  ;;  %v636_v11 = vmul.f32 %v3128_v19, %v2996_v27 }
 0x13b   : > { %v3180_v24 = vpop.permute.xlu1 %839  ;;  %v640_v63 = vmul.f32 %v3128_v19, %v3002_v33  ;;  %v731_v33 = vmul.f32 %v3137_v34, %v3016_v43 }
 0x13c   : > { %4345 = vst [vmem:[#allocation28_spill] sm:$0xff] %v3180_v24  ;;  %v3191_v25 = vpop.permute.xlu0 %542  ;;  %1602 = vperm.xlu1 %2371, %v2770_v2   ;;  %v625_v24 = vmul.f32 %v3131_v14, %v2975_v56  ;;  %v617_v56 = vmul.f32 %v3131_v14, %v2961_v45  ;;  %v3214_v2 = vadd.f32 %v735_v10, %v621_v28 }
 0x13d   : > { %4347 = vst [vmem:[#allocation30_spill] sm:$0xff] %v3191_v25  ;;  %v3216_v25 = vadd.f32 %v738_v61, %v624_v37  ;;  %v637_v45 = vmul.f32 %v3131_v14, %v2996_v27  ;;  %v3233_v37 = vadd.f32 %v742_v12, %v628_v30  ;;  %v3239_v28 = vadd.f32 %v743_v8, %v629_v16 }
 0x13e   : > { %v3231_v10 = vadd.f32 %v739_v50, %v625_v24  ;;  %v3241_v42 = vadd.f32 %v746_v23, %v632_v51  ;;  %v750_v27 = vmul.f32 %v3134_v6, %v2992_v22  ;;  %v751_v61 = vmul.f32 %v3137_v34, %v2992_v22 }
 0x13f   : > { %v3218_v5 = vpop.permute.xlu1 %847  ;;  %4350 = vst [vmem:[#allocation33_spill] sm:$0xff] %v3233_v37  ;;  %4351 = vst [vmem:[#allocation34_spill] sm:$0xff] %v3239_v28  ;;  %v754_v24 = vmul.f32 %v3134_v6, %v2998_v29  ;;  %v755_v50 = vmul.f32 %v3137_v34, %v2998_v29  ;;  %v730_v12 = vmul.f32 %v3134_v6, %v3016_v43  ;;  %v4356_v29 = vmov 7  }
 0x140   : > { %4348 = vst [vmem:[#allocation31_spill] sm:$0xff] %v3218_v5  ;;  %v3228_v18 = vpop.permute.xlu0 %550  ;;  %1606 = vperm.xlu1 %2371, %v2790_v7   ;;  %4349 = vst [vmem:[#allocation32_spill] sm:$0xff] %v3231_v10  ;;  %v3255_v30 = vadd.f32 %v747_v57, %v633_v62  ;;  %v3257_v8 = vadd.f32 %v750_v27, %v636_v11  ;;  %v3259_v16 = vadd.f32 %v751_v61, %v637_v45 }
 0x141   : > { %4352 = vst [vmem:[#allocation35_spill] sm:$0xff] %v3241_v42  ;;  %v3263_v22 = vmul.f32 %v3160_v40, %v3004_v35  ;;  %v3270_v5 = vadd.f32 %v754_v24, %v640_v63  ;;  %v3272_v42 = vadd.f32 %v755_v50, %v641_v21  ;;  %v3276_v43 = vmul.f32 %v3167_v41, %v3004_v35 }
 0x142   : > { %4353 = vst [vmem:[#allocation36_spill] sm:$0xff] %v3255_v30  ;;  %4354 = vst [vmem:[#allocation37_spill] sm:$0xff] %v3257_v8  ;;  %v726_v11 = vmul.f32 %v3134_v6, %v3009_v38  ;;  %v727_v57 = vmul.f32 %v3137_v34, %v3009_v38  ;;  %v3285_v62 = vmul.f32 %v3160_v40, %v3011_v39 }
 0x143   : > { %4355 = vst [vmem:[#allocation38_spill] sm:$0xff] %v3259_v16  ;;  %4357 = vst [vmem:[#allocation39_spill] sm:$0xff] %v3270_v5  ;;  %v3289_v45 = vmul.f32 %v3167_v41, %v3011_v39  ;;  %v3293_v35 = vmul.f32 %v3160_v40, %v3018_v44  ;;  %v762_v63 = vadd.f32 %v730_v12, %v616_v26 }
 0x144   : > { %v3265_v23 = vpop.permute.xlu1 %937  ;;  %v3267_v51 = vpop.permute.xlu0 %558  ;;  %2372 = vset.pattern.permute.xlu1 %v4356_v29  ;;  %4358 = vst [vmem:[#allocation40_spill] sm:$0xff] %v3272_v42  ;;  %v763_v21 = vadd.f32 %v731_v33, %v617_v56  ;;  %v3301_v38 = vmul.f32 %v3134_v6, %v3022_v47  ;;  %v3305_v27 = vmul.f32 %v3137_v34, %v3022_v47 }
 0x145   : > { %1759 = vperm.xlu1 %2372, %v2761_v1   ;;  %v3297_v1 = vmul.f32 %v3167_v41, %v3018_v44  ;;  %v3309_v39 = vmul.f32 %v3160_v40, %v3024_v48  ;;  %v3313_v26 = vmul.f32 %v3167_v41, %v3024_v48  ;;  %v3317_v44 = vmul.f32 %v3134_v6, %v3027_v49 }
 0x146   : > { %v3325_v47 = vmul.f32 %v3137_v34, %v3027_v49  ;;  %v3329_v24 = vmul.f32 %v3160_v40, %v3029_v32  ;;  %v3333_v48 = vmul.f32 %v3167_v41, %v3029_v32  ;;  %v3337_v50 = vmul.f32 %v3134_v6, %v3033_v9 }
 0x147   : > { %v3342_v12 = vmul.f32 %v3137_v34, %v3033_v9  ;;  %v3346_v49 = vmul.f32 %v3160_v40, %v3035_v36  ;;  %v3350_v33 = vmul.f32 %v3167_v41, %v3035_v36  ;;  %v3354_v32 = vmul.f32 %v3134_v6, %v3039_v52 }
 0x148   : > { %v3319_v56 = vpop.permute.xlu1 %945  ;;  %v3321_v61 = vpop.permute.xlu0 %566  ;;  %v3358_v42 = vmul.f32 %v3137_v34, %v3039_v52  ;;  %v3362_v9 = vmul.f32 %v3160_v40, %v3041_v53  ;;  %v3366_v5 = vmul.f32 %v3167_v41, %v3041_v53  ;;  %v874_v36 = vmul.f32 %v3160_v40, %v3074_v4 }
 0x149   : > { %4359 = vst [vmem:[#allocation41_spill] sm:$0xff] %v3319_v56  ;;  %1763 = vperm.xlu1 %2372, %v2775_v3   ;;  %4360 = vst [vmem:[#allocation42_spill] sm:$0xff] %v3346_v49  ;;  %v3372_v16 = vmul.f32 %v3134_v6, %v3045_v13  ;;  %v3376_v8 = vmul.f32 %v3137_v34, %v3045_v13  ;;  %v3380_v52 = vmul.f32 %v3160_v40, %v3047_v54  ;;  %v4373_v49 = vld [vmem:[#allocation12_spill] sm:$0xff] }
 0x14a   : > { %4361 = vst [vmem:[#allocation43_spill] sm:$0xff] %v3350_v33  ;;  %4362 = vst [vmem:[#allocation44_spill] sm:$0xff] %v3362_v9  ;;  %v875_v30 = vmul.f32 %v3167_v41, %v3074_v4  ;;  %v3388_v28 = vmul.f32 %v3167_v41, %v3047_v54  ;;  %v3392_v37 = vmul.f32 %v3134_v6, %v3052_v15  ;;  %v4372_v33 = vld [vmem:[#allocation29_spill] sm:$0xff] }
 0x14b   : > { %4363 = vst [vmem:[#allocation45_spill] sm:$0xff] %v3366_v5  ;;  %4364 = vst [vmem:[#allocation46_spill] sm:$0xff] %v3372_v16  ;;  %v612_v13 = vmul.f32 %v3128_v19, %v3156_v55  ;;  %v3401_v4 = vmul.f32 %v3137_v34, %v3052_v15  ;;  %v1020_v54 = vmul.f32 %v3170_v20, %v3055_v58 }
 0x14c   : > { %4365 = vst [vmem:[#allocation47_spill] sm:$0xff] %v3376_v8  ;;  %4366 = vst [vmem:[#allocation48_spill] sm:$0xff] %v3380_v52  ;;  %v950_v53 = vpop.permute.xlu1 %949  ;;  %v3384_v5 = vpop.permute.xlu0 %574  ;;  %v613_v52 = vmul.f32 %v3131_v14, %v3156_v55  ;;  %v3409_v9 = vmul.f32 %v3134_v6, %v3067_v17  ;;  %v3417_v55 = vmul.f32 %v3170_v20, %v3069_v59  ;;  %v4379_v8 = vmov 8  }
 0x14d   : > { %4367 = vst [vmem:[#allocation49_spill] sm:$0xff] %v3388_v28  ;;  %4368 = vst [vmem:[#allocation50_spill] sm:$0xff] %v3392_v37  ;;  %1767 = vperm.xlu1 %2372, %v2756_v0   ;;  %v1021_v28 = vmul.f32 %v3189_v31, %v3055_v58  ;;  %v3413_v37 = vmul.f32 %v3137_v34, %v3067_v17  ;;  %v3421_v15 = vmul.f32 %v3189_v31, %v3069_v59 }
 0x14e   : > { %4369 = vst [vmem:[#allocation51_spill] sm:$0xff] %v3401_v4  ;;  %4370 = vst [vmem:[#allocation52_spill] sm:$0xff] %v3409_v9  ;;  %v906_v4 = vadd.f32 %v874_v36, %v3182_v46  ;;  %v907_v58 = vadd.f32 %v875_v30, %v4372_v33  ;;  %v3427_v6 = vmul.f32 %v3170_v20, %v4373_v49  ;;  %v4375_v9 = vld [vmem:[#allocation15_spill] sm:$0xff]  ;;  %v4378_v30 = vld [vmem:[#allocation30_spill] sm:$0xff] }
 0x14f   : > { %4371 = vst [vmem:[#allocation53_spill] sm:$0xff] %v3413_v37  ;;  %v876_v17 = vmul.f32 %v3160_v40, %v4375_v9  ;;  %v877_v34 = vmul.f32 %v3167_v41, %v4375_v9  ;;  %v3437_v59 = vmul.f32 %v3189_v31, %v4373_v49  ;;  %v758_v46 = vadd.f32 %v726_v11, %v612_v13 }
 0x150   : > { %4374 = vst [vmem:[#allocation29_spill] sm:$0xff] %v3427_v6  ;;  %v958_v37 = vpop.permute.xlu1 %957  ;;  %v3433_v56 = vpop.permute.xlu0 %582  ;;  %v759_v36 = vadd.f32 %v727_v57, %v613_v52  ;;  %v618_v33 = vmul.f32 %v3128_v19, %v4378_v30  ;;  %v4380_v6 = vld [vmem:[#allocation16_spill] sm:$0xff]  ;;  %v619_v11 = vmul.f32 %v3131_v14, %v4378_v30  ;;  %v1018_v49 = vmul.f32 %v3170_v20, %v3265_v23 }
 0x151   : > { %4376 = vst [vmem:[#allocation12_spill] sm:$0xff] %v3433_v56  ;;  %4377 = vst [vmem:[#allocation15_spill] sm:$0xff] %v3437_v59  ;;  %2373 = vset.pattern.permute.xlu1 %v4379_v8  ;;  %v3444_v7 = vmul.f32 %v3170_v20, %v4380_v6  ;;  %v3448_v9 = vmul.f32 %v3189_v31, %v4380_v6  ;;  %v4383_v56 = vld [vmem:[#allocation18_spill] sm:$0xff]  ;;  %v1019_v52 = vmul.f32 %v3189_v31, %v3265_v23 }
 0x152   : > { %v880_v16 = vmul.f32 %v3160_v40, %v4383_v56  ;;  %1932 = vperm.xlu1 %2373, %v2775_v3   ;;  %v881_v57 = vmul.f32 %v3167_v41, %v4383_v56  ;;  %v3461_v13 = vadd.f32 %v1020_v54, %v906_v4  ;;  %v3463_v6 = vadd.f32 %v876_v17, %v762_v63  ;;  %v4384_v56 = vld [vmem:[#allocation19_spill] sm:$0xff] }
 0x153   : > { %4381 = vst [vmem:[#allocation30_spill] sm:$0xff] %v3444_v7  ;;  %4382 = vst [vmem:[#allocation16_spill] sm:$0xff] %v3448_v9  ;;  %v3465_v9 = vadd.f32 %v877_v34, %v763_v21  ;;  %v622_v30 = vmul.f32 %v3128_v19, %v3228_v18  ;;  %v3471_v59 = vadd.f32 %v1021_v28, %v907_v58 }
 0x154   : > { %v966_v7 = vpop.permute.xlu1 %965  ;;  %v3469_v3 = vpop.permute.xlu0 %590  ;;  %v3475_v10 = vmul.f32 %v3170_v20, %v4384_v56  ;;  %v764_v23 = vadd.f32 %v3301_v38, %v618_v33  ;;  %v904_v4 = vadd.f32 %v3263_v22, %v758_v46  ;;  %v905_v63 = vadd.f32 %v3276_v43, %v759_v36  ;;  %v4385_v38 = vld [vmem:[#allocation9_spill] sm:$0xff] }
 0x155   : > { %v912_v21 = vadd.f32 %v880_v16, %v3212_v60  ;;  %v3483_v54 = vmul.f32 %v3189_v31, %v4384_v56  ;;  %v765_v17 = vadd.f32 %v3305_v27, %v619_v11  ;;  %v623_v28 = vmul.f32 %v3131_v14, %v3228_v18  ;;  %v4386_v16 = vld [vmem:[#allocation21_spill] sm:$0xff] }
 0x156   : > { %2374 = vset.pattern.permute.xlu1 %v4356_v29  ;;  %v3490_v58 = vadd.f32 %v881_v57, %v3214_v2  ;;  %v1024_v22 = vmul.f32 %v3170_v20, %v950_v53  ;;  %v1050_v43 = vadd.f32 %v1018_v49, %v904_v4  ;;  %v1051_v60 = vadd.f32 %v1019_v52, %v905_v63  ;;  %v4387_v52 = vld [vmem:[#allocation22_spill] sm:$0xff] }
 0x157   : > { %1771 = vperm.xlu1 %2374, %v4385_v38   ;;  %v3496_v34 = vmul.f32 %v3160_v40, %v4386_v16  ;;  %v768_v27 = vadd.f32 %v3317_v44, %v622_v30  ;;  %v626_v18 = vmul.f32 %v3128_v19, %v3267_v51  ;;  %v1025_v46 = vmul.f32 %v3189_v31, %v950_v53 }
 0x158   : > { %v974_v36 = vpop.permute.xlu1 %973  ;;  %v1085_v2 = vpop.permute.xlu0 %1084  ;;  %v3504_v33 = vmul.f32 %v3167_v41, %v4386_v16  ;;  %v910_v49 = vadd.f32 %v3285_v62, %v764_v23  ;;  %v3513_v44 = vmul.f32 %v3170_v20, %v4387_v52  ;;  %v769_v30 = vadd.f32 %v3325_v47, %v623_v28 }
 0x159   : > { %v3506_v11 = vadd.f32 %v1085_v2, %v1050_v43  ;;  %v3508_v57 = vadd.f32 %v1085_v2, %v1051_v60  ;;  %v627_v53 = vmul.f32 %v3131_v14, %v3267_v51  ;;  %v911_v56 = vadd.f32 %v3289_v45, %v765_v17 }
 0x15a   : > { %v3521_v4 = vmul.f32 %v3189_v31, %v4387_v52  ;;  %v1028_v63 = vmul.f32 %v3170_v20, %v958_v37  ;;  %v1056_v62 = vadd.f32 %v1024_v22, %v910_v49  ;;  %v772_v23 = vadd.f32 %v3337_v50, %v626_v18 }
 0x15b   : > { %v2248_v38 = vmul.f32 -1.442695, %v3506_v11  ;;  %2375 = vset.pattern.permute.xlu1 %v4379_v8  ;;  %v1029_v47 = vmul.f32 %v3189_v31, %v958_v37  ;;  %v1057_v45 = vadd.f32 %v1025_v46, %v911_v56  ;;  %v914_v17 = vadd.f32 %v3293_v35, %v768_v27 }
 0x15c   : > { %v3528_v28 = vpop.permute.xlu1 %981  ;;  %1936 = vperm.xlu1 %2375, %v2756_v0   ;;  %v1100_v51 = vpop.permute.xlu0 %1099  ;;  %v630_v43 = vmul.f32 %v3128_v19, %v3321_v61  ;;  %v631_v60 = vmul.f32 %v3131_v14, %v3321_v61  ;;  %v2249_v22 = vmul.f32 -1.442695, %v3508_v57  ;;  %v773_v37 = vadd.f32 %v3342_v12, %v627_v53 }
 0x15d   : > { %v3537_v16 = vadd.f32 %v1100_v51, %v1056_v62  ;;  %2404 = vpow2.f32 %v2248_v38  ;;  %v3540_v50 = vadd.f32 %v1100_v51, %v1057_v45  ;;  %v915_v0 = vadd.f32 %v3297_v1, %v769_v30 }
 0x15e   : > { %v1032_v18 = vmul.f32 %v3170_v20, %v966_v7  ;;  %v1060_v27 = vadd.f32 %v1028_v63, %v914_v17  ;;  %v3546_v46 = vadd.f32 %v3417_v55, %v912_v21  ;;  %v1033_v61 = vmul.f32 %v3189_v31, %v966_v7  ;;  %v4389_v55 = vld [vmem:[#allocation10_spill] sm:$0xff] }
 0x15f   : > { %v2254_v35 = vmul.f32 -1.442695, %v3537_v16  ;;  %v2255_v2 = vmul.f32 -1.442695, %v3540_v50  ;;  %v4388_v12 = vmov 6   ;;  %v1061_v53 = vadd.f32 %v1029_v47, %v915_v0 }
 0x160   : > { %v3550_v49 = vpop.permute.xlu1 %989  ;;  %2376 = vset.pattern.permute.xlu1 %v4388_v12  ;;  %v1110_v52 = vpop.permute.xlu0 %1109  ;;  %v918_v1 = vadd.f32 %v3309_v39, %v772_v23  ;;  %v776_v30 = vadd.f32 %v3354_v32, %v630_v43  ;;  %v777_v56 = vadd.f32 %v3358_v42, %v631_v60  ;;  %2406 = vpow2.f32 %v2249_v22  ;;  %v4391_v22 = vld [vmem:[#allocation32_spill] sm:$0xff] }
 0x161   : > { %v3556_v63 = vadd.f32 %v1110_v52, %v1060_v27  ;;  %1610 = vperm.xlu1 %2376, %v4389_v55   ;;  %v634_v7 = vmul.f32 %v3128_v19, %v3384_v5  ;;  %2408 = vpow2.f32 %v2254_v35  ;;  %v3561_v21 = vadd.f32 %v1110_v52, %v1061_v53  ;;  %v4395_v35 = vld [vmem:[#allocation47_spill] sm:$0xff]  ;;  %v4396_v52 = vld [vmem:[#allocation25_spill] sm:$0xff] }
 0x162   : > { %v919_v38 = vadd.f32 %v3313_v26, %v773_v37  ;;  %v635_v39 = vmul.f32 %v3131_v14, %v3384_v5  ;;  %v1036_v32 = vmul.f32 %v3170_v20, %v974_v36  ;;  %v1037_v42 = vmul.f32 %v3189_v31, %v974_v36 }
 0x163   : > { %v1064_v62 = vadd.f32 %v1032_v18, %v918_v1  ;;  %2410 = vpow2.f32 %v2255_v2  ;;  %v2258_v23 = vmul.f32 -1.442695, %v3556_v63  ;;  %v3573_v17 = vadd.f32 %v3421_v15, %v3490_v58  ;;  %v4392_v15 = vld [vmem:[#allocation46_spill] sm:$0xff]  ;;  %v4394_v18 = vld [vmem:[#allocation11_spill] sm:$0xff] }
 0x164   : > { %v3569_v47 = vpop.permute.xlu1 %997  ;;  %v1120_v51 = vpop.permute.xlu0 %1119  ;;  %v1065_v45 = vadd.f32 %v1033_v61, %v919_v38  ;;  %v2259_v26 = vmul.f32 -1.442695, %v3561_v21  ;;  %v922_v5 = vadd.f32 %v3329_v24, %v776_v30  ;;  %v923_v36 = vadd.f32 %v3333_v48, %v777_v56 }
 0x165   : > { %v3576_v43 = vadd.f32 %v1120_v51, %v1064_v62  ;;  %2377 = vset.pattern.permute.xlu1 %v4356_v29  ;;  %v3583_v60 = vadd.f32 %v3496_v34, %v3216_v25  ;;  %v3587_v37 = vadd.f32 %v3504_v33, %v4391_v22  ;;  %v780_v58 = vadd.f32 %v4392_v15, %v634_v7  ;;  %v4399_v7 = vld [vmem:[#allocation41_spill] sm:$0xff]  ;;  %v4401_v62 = vld [vmem:[#allocation42_spill] sm:$0xff] }
 0x166   : > { %v3590_v0 = vadd.f32 %v1120_v51, %v1065_v45  ;;  %1775 = vperm.xlu1 %2377, %v4394_v18   ;;  %v781_v27 = vadd.f32 %v4395_v35, %v635_v39  ;;  %v1068_v61 = vadd.f32 %v1036_v32, %v922_v5  ;;  %v1069_v48 = vadd.f32 %v1037_v42, %v923_v36  ;;  %v4400_v39 = vld [vmem:[#allocation12_spill] sm:$0xff]  ;;  %v4402_v5 = vld [vmem:[#allocation43_spill] sm:$0xff] }
 0x167   : > { %4390 = vst [vmem:[#allocation18_spill] sm:$0xff] %v3576_v43  ;;  %v2262_v24 = vmul.f32 -1.442695, %v3576_v43  ;;  %v2405_v2 = vpop.eup %2404  ;;  %v3597_v25 = vmul.f32 %v3160_v40, %v4396_v52  ;;  %v1040_v34 = vmul.f32 %v3170_v20, %v3528_v28  ;;  %2412 = vpow2.f32 %v2258_v23 }
 0x168   : > { %4393 = vst [vmem:[#allocation19_spill] sm:$0xff] %v3590_v0  ;;  %v2263_v33 = vmul.f32 -1.442695, %v3590_v0  ;;  %v1130_v53 = vpop.permute.xlu0 %1129  ;;  %v1041_v1 = vmul.f32 %v3189_v31, %v3528_v28  ;;  %2414 = vpow2.f32 %v2259_v26  ;;  %v1022_v38 = vmul.f32 %v3170_v20, %v4399_v7  ;;  %v2532_v26 = vld [vmem:[%s4267_s6 + $0x18] sm:$0xff] }
 0x169   : > { %v3604_v30 = vadd.f32 %v1130_v53, %v1068_v61  ;;  %v3606_v56 = vadd.f32 %v1130_v53, %v1069_v48  ;;  %v1090_v55 = vpop.permute.xlu1 %1089  ;;  %v638_v32 = vmul.f32 %v3128_v19, %v4400_v39  ;;  %v926_v23 = vadd.f32 %v4401_v62, %v780_v58 }
 0x16a   : > { %v3613_v42 = vadd.f32 %v1090_v55, %v3461_v13  ;;  %2378 = vset.pattern.permute.xlu1 %v4379_v8  ;;  %v2407_v28 = vpop.eup %2406  ;;  %v1290_v51 = vadd.f32 1.0, %v2405_v2  ;;  %2416 = vpow2.f32 %v2262_v24  ;;  %v927_v36 = vadd.f32 %v4402_v5, %v781_v27 }
 0x16b   : > { %4397 = vst [vmem:[#allocation9_spill] sm:$0xff] %v3604_v30  ;;  %4398 = vst [vmem:[#allocation21_spill] sm:$0xff] %v3606_v56  ;;  %v2266_v45 = vmul.f32 -1.442695, %v3604_v30  ;;  %1940 = vperm.xlu1 %2378, %v2532_v26   ;;  %v2409_v22 = vpop.eup %2408  ;;  %2418 = vpow2.f32 %v2263_v33  ;;  %v2267_v13 = vmul.f32 -1.442695, %v3606_v56  ;;  %v3624_v15 = vadd.f32 %v1090_v55, %v3471_v59 }
 0x16c   : > { %v1140_v58 = vpop.permute.xlu0 %1139  ;;  %v1072_v18 = vadd.f32 %v1040_v34, %v926_v23  ;;  %v1023_v35 = vmul.f32 %v3189_v31, %v4399_v7  ;;  %v2250_v24 = vmul.f32 -1.442695, %v3613_v42  ;;  %v1073_v61 = vadd.f32 %v1041_v1, %v927_v36  ;;  %v4404_v55 = vld [vmem:[#allocation50_spill] sm:$0xff] }
 0x16d   : > { %2420 = vpow2.f32 %v2266_v45  ;;  %v1095_v48 = vpop.permute.xlu1 %1094  ;;  %v2411_v2 = vpop.eup %2410  ;;  %v889_v27 = vmul.f32 %v3167_v41, %v4396_v52  ;;  %v1291_v33 = vadd.f32 1.0, %v2407_v28  ;;  %v1054_v59 = vadd.f32 %v1022_v38, %v3463_v6  ;;  %v4406_v7 = vld [vmem:[#allocation26_spill] sm:$0xff]  ;;  %v3648_v6 = vld [vmem:[%s4267_s6 + $0x30] sm:$0xff] }
 0x16e   : > { %v3631_v53 = vadd.f32 %v1140_v58, %v1072_v18  ;;  %v784_v62 = vadd.f32 %v4404_v55, %v638_v32  ;;  %2422 = vrcp.f32 %v1290_v51  ;;  %v1296_v34 = vadd.f32 1.0, %v2409_v22 }
 0x16f   : > { %v3635_v23 = vadd.f32 %v1140_v58, %v1073_v61  ;;  %2379 = vset.pattern.permute.xlu1 %v4388_v12  ;;  %v3640_v1 = vmul.f32 %v3170_v20, %v4406_v7  ;;  %2424 = vpow2.f32 %v2267_v13  ;;  %v2251_v52 = vmul.f32 -1.442695, %v3624_v15 }
 0x170   : > { %4403 = vst [vmem:[#allocation22_spill] sm:$0xff] %v3631_v53  ;;  %v3643_v28 = vadd.f32 %v1095_v48, %v1054_v59  ;;  %1614 = vperm.xlu1 %2379, %v3648_v6   ;;  %v1297_v38 = vadd.f32 1.0, %v2411_v2  ;;  %v1044_v32 = vmul.f32 %v3170_v20, %v3550_v49  ;;  %2426 = vpow2.f32 %v2250_v24  ;;  %v4407_v24 = vld [vmem:[#allocation44_spill] sm:$0xff]  ;;  %v1150_v61 = vpop.permute.xlu0 %1149  ;;  %v4408_v2 = vld [vmem:[#allocation29_spill] sm:$0xff] }
 0x171   : > { %4405 = vst [vmem:[#allocation10_spill] sm:$0xff] %v3635_v23  ;;  %v1055_v51 = vadd.f32 %v1023_v35, %v3465_v9  ;;  %v1105_v45 = vpop.permute.xlu1 %1104  ;;  %v2413_v26 = vpop.eup %2412  ;;  %v3656_v5 = vmul.f32 %v3189_v31, %v4406_v7  ;;  %v639_v36 = vmul.f32 %v3131_v14, %v4400_v39  ;;  %2428 = vrcp.f32 %v1291_v33  ;;  %v4409_v33 = vld [vmem:[#allocation15_spill] sm:$0xff] }
 0x172   : > { %v2270_v22 = vmul.f32 -1.442695, %v3631_v53  ;;  %v2415_v13 = vpop.eup %2414  ;;  %2430 = vrcp.f32 %v1296_v34  ;;  %v2271_v58 = vmul.f32 -1.442695, %v3635_v23  ;;  %v930_v9 = vadd.f32 %v4407_v24, %v784_v62  ;;  %v4410_v34 = vld [vmem:[#allocation33_spill] sm:$0xff]  ;;  %v4411_v24 = vld [vmem:[#allocation27_spill] sm:$0xff] }
 0x173   : > { %v3662_v18 = vadd.f32 %v1095_v48, %v1055_v51  ;;  %2432 = vpow2.f32 %v2251_v52  ;;  %v2252_v35 = vmul.f32 -1.442695, %v3643_v28  ;;  %v3669_v39 = vadd.f32 %v4408_v2, %v3583_v60  ;;  %v2534_v52 = vld [vmem:[%s4267_s6 + $0x28] sm:$0xff] }
 0x174   : > { %2380 = vset.pattern.permute.xlu1 %v4356_v29  ;;  %v3673_v59 = vadd.f32 %v4409_v33, %v3587_v37  ;;  %v2417_v55 = vpop.eup %2416  ;;  %v920_v48 = vadd.f32 %v3597_v25, %v4410_v34  ;;  %2434 = vrcp.f32 %v1297_v38  ;;  %v1300_v62 = vadd.f32 1.0, %v2413_v26  ;;  %v4412_v37 = vld [vmem:[#allocation51_spill] sm:$0xff] }
 0x175   : > { %v1076_v7 = vadd.f32 %v1044_v32, %v930_v9  ;;  %1779 = vperm.xlu1 %2380, %v2534_v52   ;;  %v3680_v51 = vpop.permute.xlu1 %1114  ;;  %v2419_v60 = vpop.eup %2418  ;;  %v892_v2 = vmul.f32 %v3160_v40, %v4411_v24  ;;  %v785_v33 = vadd.f32 %v4412_v37, %v639_v36  ;;  %v1301_v23 = vadd.f32 1.0, %v2415_v13 }
 0x176   : > { %2436 = vpow2.f32 %v2270_v22  ;;  %v642_v25 = vmul.f32 %v3128_v19, %v3469_v3  ;;  %v2253_v38 = vmul.f32 -1.442695, %v3662_v18  ;;  %v1045_v26 = vmul.f32 %v3189_v31, %v3550_v49  ;;  %v4414_v22 = vld [vmem:[#allocation34_spill] sm:$0xff] }
 0x177   : > { %v2421_v53 = vpop.eup %2420  ;;  %2438 = vpow2.f32 %v2271_v58  ;;  %v3688_v32 = vadd.f32 %v1150_v61, %v1076_v7  ;;  %v1304_v9 = vadd.f32 1.0, %v2417_v55  ;;  %v3693_v34 = vadd.f32 %v1105_v45, %v3546_v46  ;;  %v4416_v46 = vld [vmem:[#allocation30_spill] sm:$0xff] }
 0x178   : > { %2440 = vpow2.f32 %v2252_v35  ;;  %v3695_v36 = vpop.eup %2422  ;;  %v921_v13 = vadd.f32 %v889_v27, %v4414_v22  ;;  %v893_v19 = vmul.f32 %v3167_v41, %v4411_v24  ;;  %v1305_v58 = vadd.f32 1.0, %v2419_v60  ;;  %v4415_v35 = vld [vmem:[#allocation45_spill] sm:$0xff] }
 0x179   : > { %4413 = vst [vmem:[#allocation32_spill] sm:$0xff] %v3688_v32  ;;  %2442 = vrcp.f32 %v1300_v62  ;;  %2381 = vset.pattern.permute.xlu1 %v4379_v8  ;;  %v3701_v7 = vpop.permute.xlu1 %1124  ;;  %v2425_v52 = vpop.eup %2424  ;;  %v1308_v49 = vadd.f32 1.0, %v2421_v53  ;;  %v931_v55 = vadd.f32 %v4415_v35, %v785_v33  ;;  %v3705_v37 = vadd.f32 %v4416_v46, %v920_v48  ;;  %v2535_v27 = vld [vmem:[%s4267_s6 + $0x20] sm:$0xff]  ;;  %v4417_v62 = vld [vmem:[#allocation35_spill] sm:$0xff] }
 0x17a   : > { %2444 = vrcp.f32 %v1301_v23  ;;  %1944 = vperm.xlu1 %2381, %v2535_v27   ;;  %v2427_v24 = vpop.eup %2426  ;;  %v924_v60 = vadd.f32 %v892_v2, %v4417_v62  ;;  %v2274_v22 = vmul.f32 -1.442695, %v3688_v32  ;;  %v3713_v56 = vadd.f32 %v1105_v45, %v3573_v17  ;;  %v4419_v23 = vld [vmem:[#allocation52_spill] sm:$0xff] }
 0x17b   : > { %2446 = vpow2.f32 %v2253_v38  ;;  %v3715_v53 = vpop.eup %2428  ;;  %v788_v33 = vadd.f32 %v4419_v23, %v642_v25  ;;  %v1077_v48 = vadd.f32 %v1045_v26, %v931_v55  ;;  %v2256_v35 = vmul.f32 -1.442695, %v3693_v34  ;;  %v4420_v27 = vld [vmem:[#allocation36_spill] sm:$0xff] }
 0x17c   : > { %4418 = vst [vmem:[#allocation46_spill] sm:$0xff] %v3713_v56  ;;  %2448 = vrcp.f32 %v1304_v9  ;;  %v3719_v46 = vpop.eup %2430  ;;  %v925_v30 = vadd.f32 %v893_v19, %v4420_v27  ;;  %v643_v2 = vmul.f32 %v3131_v14, %v3469_v3  ;;  %v1309_v38 = vadd.f32 1.0, %v2425_v52  ;;  %v4421_v19 = vld [vmem:[#allocation28_spill] sm:$0xff] }
 0x17d   : > { %2450 = vrcp.f32 %v1305_v58  ;;  %v3724_v62 = vpop.permute.xlu1 %1134  ;;  %v2433_v17 = vpop.eup %2432  ;;  %v1048_v45 = vmul.f32 %v3170_v20, %v3569_v47  ;;  %v1292_v25 = vadd.f32 1.0, %v2427_v24  ;;  %v3728_v26 = vadd.f32 %v1150_v61, %v1077_v48  ;;  %v4422_v3 = vld [vmem:[#allocation16_spill] sm:$0xff]  ;;  %v4424_v48 = vld [vmem:[#allocation53_spill] sm:$0xff] }
 0x17e   : > { %2452 = vrcp.f32 %v1308_v49  ;;  %2382 = vset.pattern.permute.xlu1 %v4388_v12  ;;  %v3731_v9 = vpop.eup %2434  ;;  %v896_v55 = vmul.f32 %v3160_v40, %v4421_v19  ;;  %v2257_v14 = vmul.f32 -1.442695, %v3713_v56  ;;  %v1067_v58 = vadd.f32 %v4422_v3, %v921_v13  ;;  %v3740_v20 = vld [vmem:[%s4267_s6 + $0x38] sm:$0xff]  ;;  %v1160_v13 = vpop.permute.xlu0 %1159 }
 0x17f   : > { %2454 = vpow2.f32 %v2274_v22  ;;  %1618 = vperm.xlu1 %2382, %v3740_v20   ;;  %v897_v52 = vmul.f32 %v3167_v41, %v4421_v19  ;;  %v1293_v49 = vadd.f32 1.0, %v2433_v17  ;;  %v4423_v24 = vld [vmem:[#allocation48_spill] sm:$0xff]  ;;  %v789_v27 = vadd.f32 %v4424_v48, %v643_v2  ;;  %v4426_v17 = vld [vmem:[#allocation31_spill] sm:$0xff]  ;;  %v4428_v48 = vld [vmem:[#allocation38_spill] sm:$0xff] }
 0x180   : > { %v2437_v61 = vpop.eup %2436  ;;  %2456 = vpow2.f32 %v2256_v35  ;;  %v934_v23 = vadd.f32 %v4423_v24, %v788_v33  ;;  %v1070_v3 = vadd.f32 %v3475_v10, %v924_v60  ;;  %v1071_v32 = vadd.f32 %v3483_v54, %v925_v30  ;;  %v4425_v30 = vld [vmem:[#allocation37_spill] sm:$0xff] }
 0x181   : > { %v2439_v22 = vpop.eup %2438  ;;  %2458 = vrcp.f32 %v1309_v38  ;;  %v3749_v0 = vpop.permute.xlu1 %1144  ;;  %v2275_v56 = vmul.f32 -1.442695, %v3728_v26  ;;  %v3754_v35 = vadd.f32 %v3680_v51, %v3669_v39  ;;  %v1312_v2 = vadd.f32 1.0, %v2437_v61 }
 0x182   : > { %v2441_v43 = vpop.eup %2440  ;;  %2460 = vrcp.f32 %v1292_v25  ;;  %v1080_v19 = vadd.f32 %v1048_v45, %v934_v23  ;;  %v3760_v10 = vadd.f32 %v3680_v51, %v3673_v59  ;;  %v928_v60 = vadd.f32 %v896_v55, %v4425_v30 }
 0x183   : > { %v3756_v33 = vpop.eup %2442  ;;  %v1294_v38 = vadd.f32 1.0, %v2441_v43  ;;  %2462 = vpow2.f32 %v2257_v14  ;;  %2383 = vset.pattern.permute.xlu1 %v4356_v29  ;;  %v900_v45 = vmul.f32 %v3160_v40, %v4426_v17  ;;  %v901_v25 = vmul.f32 %v3167_v41, %v4426_v17  ;;  %v4427_v41 = vld [vmem:[#allocation49_spill] sm:$0xff] }
 0x184   : > { %v3763_v54 = vpop.eup %2444  ;;  %2464 = vrcp.f32 %v1293_v49  ;;  %v3768_v39 = vadd.f32 %v1160_v13, %v1080_v19  ;;  %1783 = vperm.xlu1 %2383, %v3648_v6   ;;  %v1049_v59 = vmul.f32 %v3189_v31, %v3569_v47  ;;  %v1313_v51 = vadd.f32 1.0, %v2439_v22  ;;  %v4429_v19 = vld [vmem:[#allocation39_spill] sm:$0xff] }
 0x185   : > { %v2447_v43 = vpop.eup %2446  ;;  %2466 = vrcp.f32 %v1294_v38  ;;  %v1155_v14 = vpop.permute.xlu1 %1154  ;;  %v2260_v40 = vmul.f32 -1.442695, %v3754_v35  ;;  %v3780_v49 = vadd.f32 %v3701_v7, %v3705_v37  ;;  %v935_v23 = vadd.f32 %v4427_v41, %v789_v27 }
 0x186   : > { %v3775_v61 = vpop.eup %2448  ;;  %v1295_v55 = vadd.f32 1.0, %v2447_v43  ;;  %2468 = vpow2.f32 %v2275_v56  ;;  %v2261_v31 = vmul.f32 -1.442695, %v3760_v10  ;;  %v3787_v47 = vadd.f32 %v3701_v7, %v1067_v58  ;;  %v3804_v58 = vld [vmem:[%s4267_s6 + $0x40] sm:$0xff] }
 0x187   : > { %v3782_v24 = vpop.eup %2450  ;;  %2470 = vrcp.f32 %v1312_v2  ;;  %v929_v56 = vadd.f32 %v897_v52, %v4428_v48  ;;  %v932_v38 = vadd.f32 %v900_v45, %v4429_v19  ;;  %v2278_v37 = vmul.f32 -1.442695, %v3768_v39  ;;  %v4430_v2 = vld [vmem:[#allocation40_spill] sm:$0xff] }
 0x188   : > { %v3789_v22 = vpop.eup %2452  ;;  %2472 = vrcp.f32 %v1295_v55  ;;  %2384 = vset.pattern.permute.xlu1 %v4388_v12  ;;  %v933_v27 = vadd.f32 %v901_v25, %v4430_v2  ;;  %v1081_v17 = vadd.f32 %v1049_v59, %v935_v23  ;;  %v3799_v7 = vadd.f32 %v3724_v62, %v1070_v3  ;;  %v1424_v2 = vpop.permute.xlu0 %1423 }
 0x189   : > { %v3795_v30 = vpop.eup %2454  ;;  %2474 = vrcp.f32 %v1313_v51  ;;  %1622 = vperm.xlu1 %2384, %v3804_v58   ;;  %v2264_v45 = vmul.f32 -1.442695, %v3780_v49  ;;  %v3809_v43 = vadd.f32 %v3724_v62, %v1071_v32  ;;  %v1074_v25 = vadd.f32 %v3513_v44, %v928_v60 }
 0x18a   : > { %v2457_v52 = vpop.eup %2456  ;;  %2476 = vpow2.f32 %v2260_v40  ;;  %v1420_v59 = vpop.permute.xlu1 %1419  ;;  %v3814_v55 = vadd.f32 %v1160_v13, %v1081_v17  ;;  %v2265_v41 = vmul.f32 -1.442695, %v3787_v47  ;;  %v1075_v40 = vadd.f32 %v3521_v4, %v929_v56 }
 0x18b   : > { %v3812_v51 = vpop.eup %2458  ;;  %v1298_v3 = vadd.f32 1.0, %v2457_v52  ;;  %2478 = vpow2.f32 %v2261_v31  ;;  %v1078_v48 = vadd.f32 %v3640_v1, %v932_v38  ;;  %v2268_v32 = vmul.f32 -1.442695, %v3799_v7 }
 0x18c   : > { %v2461_v23 = vpop.eup %2460  ;;  %2480 = vpow2.f32 %v2278_v37  ;;  %v3821_v44 = vadd.f32 %v3749_v0, %v1074_v25  ;;  %v1079_v62 = vadd.f32 %v3656_v5, %v933_v27  ;;  %v2269_v31 = vmul.f32 -1.442695, %v3809_v43 }
 0x18d   : > { %v2463_v19 = vpop.eup %2462  ;;  %2482 = vrcp.f32 %v1298_v3  ;;  %2386 = vset.pattern.permute.xlu1 %v4379_v8  ;;  %v3827_v4 = vadd.f32 %v3749_v0, %v1075_v40  ;;  %v3832_v38 = vmul.f32 %v3695_v36, %v3506_v11  ;;  %v3836_v5 = vmul.f32 %v3715_v53, %v3508_v57  ;;  %v3877_v3 = vld [vmem:[%s4267_s6 + $0x48] sm:$0xff] }
 0x18e   : > { %v2465_v13 = vpop.eup %2464  ;;  %v1299_v60 = vadd.f32 1.0, %v2463_v19  ;;  %2484 = vpow2.f32 %v2264_v45  ;;  %1952 = vperm.xlu1 %2386, %v3648_v6   ;;  %v1428_v1 = vpop.permute.xlu1 %1427  ;;  %v2279_v37 = vmul.f32 -1.442695, %v3814_v55  ;;  %v3842_v0 = vmul.f32 %v2461_v23, %v3613_v42 }
 0x18f   : > { %v2467_v56 = vpop.eup %2466  ;;  %2486 = vpow2.f32 %v2265_v41  ;;  %v3844_v6 = vadd.f32 %v1155_v14, %v1078_v48  ;;  %v3846_v17 = vadd.f32 %v1155_v14, %v1079_v62  ;;  %v3852_v57 = vmul.f32 %v3719_v46, %v3537_v16  ;;  %v1436_v19 = vpop.permute.xlu0 %1435 }
 0x190   : > { %v3839_v27 = vpop.eup %2468  ;;  %2488 = vrcp.f32 %v1299_v60  ;;  %v3855_v36 = vmul.f32 %v2465_v13, %v3624_v15  ;;  %v2272_v53 = vmul.f32 -1.442695, %v3821_v44  ;;  %v3859_v42 = vmul.f32 %v2467_v56, %v3643_v28 }
 0x191   : > { %v3848_v11 = vpop.eup %2470  ;;  %2490 = vpow2.f32 %v2268_v32  ;;  %v2273_v14 = vmul.f32 -1.442695, %v3827_v4  ;;  %v1482_v45 = vmul.f32 %v1420_v59, %v3832_v38  ;;  %v3868_v15 = vmul.f32 %v3731_v9, %v3540_v50 }
 0x192   : > { %v2473_v52 = vpop.eup %2472  ;;  %4431 = vst [vmem:[#allocation11_spill] sm:$0xff] %v3859_v42  ;;  %2492 = vpow2.f32 %v2269_v31  ;;  %2387 = vset.pattern.permute.xlu1 %v4388_v12  ;;  %v1432_v25 = vpop.permute.xlu1 %1431  ;;  %v1483_v28 = vmul.f32 %v1420_v59, %v3836_v5  ;;  %v1484_v23 = vmul.f32 %v1424_v2, %v3842_v0  ;;  %v2276_v40 = vmul.f32 -1.442695, %v3844_v6 }
 0x193   : > { %v3864_v16 = vpop.eup %2474  ;;  %v3871_v46 = vmul.f32 %v2473_v52, %v3662_v18  ;;  %2494 = vpow2.f32 %v2279_v37  ;;  %1626 = vperm.xlu1 %2387, %v3877_v3   ;;  %v2277_v50 = vmul.f32 -1.442695, %v3846_v17  ;;  %v1486_v18 = vmul.f32 %v1428_v1, %v3859_v42 }
 0x194   : > { %v2477_v41 = vpop.eup %2476  ;;  %v1485_v59 = vmul.f32 %v1424_v2, %v3855_v36  ;;  %2496 = vpow2.f32 %v2272_v53  ;;  %v1514_v60 = vadd.f32 %v1484_v23, %v1482_v45  ;;  %v1488_v31 = vmul.f32 %v1432_v25, %v3852_v57 }
 0x195   : > { %v2479_v9 = vpop.eup %2478  ;;  %v1302_v48 = vadd.f32 1.0, %v2477_v41  ;;  %v1487_v32 = vmul.f32 %v1428_v1, %v3871_v46  ;;  %2498 = vpow2.f32 %v2273_v14  ;;  %v1489_v42 = vmul.f32 %v1432_v25, %v3868_v15 }
 0x196   : > { %v2481_v62 = vpop.eup %2480  ;;  %v1303_v13 = vadd.f32 1.0, %v2479_v9  ;;  %v1440_v56 = vpop.permute.xlu1 %1439  ;;  %v1535_v52 = vadd.f32 %v1485_v59, %v1483_v28  ;;  %v1515_v1 = vadd.f32 %v1514_v60, %v1486_v18  ;;  %v1316_v14 = vadd.f32 1.0, %v3795_v30 }
 0x197   : > { %v2483_v37 = vpop.eup %2482  ;;  %2500 = vrcp.f32 %v1302_v48  ;;  %2389 = vset.pattern.permute.xlu1 %v4379_v8  ;;  %v3896_v25 = vmul.f32 %v3756_v33, %v3556_v63  ;;  %v3900_v18 = vmul.f32 %v3763_v54, %v3561_v21  ;;  %v1444_v30 = vpop.permute.xlu0 %1443  ;;  %v1317_v60 = vadd.f32 1.0, %v3839_v27 }
 0x198   : > { %v2485_v41 = vpop.eup %2484  ;;  %v3890_v2 = vmul.f32 %v2483_v37, %v3693_v34  ;;  %2502 = vrcp.f32 %v1303_v13  ;;  %1956 = vperm.xlu1 %2389, %v3740_v20   ;;  %v1536_v23 = vadd.f32 %v1535_v52, %v1487_v32  ;;  %v1516_v48 = vadd.f32 %v1515_v1, %v1488_v31  ;;  %v4432_v20 = vld [vmem:[#allocation46_spill] sm:$0xff] }
 0x199   : > { %v2487_v53 = vpop.eup %2486  ;;  %v1306_v45 = vadd.f32 1.0, %v2485_v41  ;;  %2504 = vpow2.f32 %v2276_v40  ;;  %v1320_v31 = vadd.f32 1.0, %v2481_v62  ;;  %v1493_v41 = vmul.f32 %v1440_v56, %v3900_v18 }
 0x19a   : > { %v2489_v9 = vpop.eup %2488  ;;  %v1307_v28 = vadd.f32 1.0, %v2487_v53  ;;  %2506 = vpow2.f32 %v2277_v50  ;;  %v1448_v34 = vpop.permute.xlu1 %1447  ;;  %v1537_v40 = vadd.f32 %v1536_v23, %v1489_v42  ;;  %v1490_v33 = vmul.f32 %v1436_v19, %v3890_v2 }
 0x19b   : > { %v2491_v59 = vpop.eup %2490  ;;  %v3903_v13 = vmul.f32 %v2489_v9, %v4432_v20  ;;  %2508 = vrcp.f32 %v1306_v45  ;;  %v1492_v42 = vmul.f32 %v1440_v56, %v3896_v25 }
 0x19c   : > { %v2493_v32 = vpop.eup %2492  ;;  %2510 = vrcp.f32 %v1307_v28  ;;  %v1310_v63 = vadd.f32 1.0, %v2491_v59  ;;  %2390 = vset.pattern.permute.xlu1 %v4356_v29  ;;  %v1517_v37 = vadd.f32 %v1516_v48, %v1490_v33  ;;  %v4433_v28 = vld [vmem:[#allocation18_spill] sm:$0xff] }
 0x19d   : > { %v2495_v50 = vpop.eup %2494  ;;  %2512 = vrcp.f32 %v1316_v14  ;;  %v1311_v21 = vadd.f32 1.0, %v2493_v32  ;;  %v1491_v54 = vmul.f32 %v1436_v19, %v3903_v13  ;;  %1795 = vperm.xlu1 %2390, %v3877_v3   ;;  %v1452_v19 = vpop.permute.xlu0 %1451  ;;  %v3915_v48 = vmul.f32 %v3775_v61, %v4433_v28  ;;  %v4434_v32 = vld [vmem:[#allocation19_spill] sm:$0xff] }
 0x19e   : > { %2514 = vrcp.f32 %v1310_v63  ;;  %v1456_v52 = vpop.permute.xlu1 %1455  ;;  %v2497_v27 = vpop.eup %2496  ;;  %v1321_v62 = vadd.f32 1.0, %v2495_v50  ;;  %v1518_v56 = vadd.f32 %v1517_v37, %v1492_v42  ;;  %v4435_v37 = vld [vmem:[#allocation9_spill] sm:$0xff] }
 0x19f   : > { %2516 = vrcp.f32 %v1311_v21  ;;  %v1538_v1 = vadd.f32 %v1537_v40, %v1491_v54  ;;  %v2499_v53 = vpop.eup %2498  ;;  %v1314_v45 = vadd.f32 1.0, %v2497_v27 }
 0x1a0   : > { %2518 = vrcp.f32 %v1317_v60  ;;  %v1315_v23 = vadd.f32 1.0, %v2499_v53  ;;  %v3923_v60 = vmul.f32 %v3782_v24, %v4434_v32 }
 0x1a1   : > { %v2501_v14 = vpop.eup %2500  ;;  %2520 = vrcp.f32 %v1320_v31  ;;  %2391 = vset.pattern.permute.xlu1 %v4379_v8  ;;  %v1539_v33 = vadd.f32 %v1538_v1, %v1493_v41  ;;  %v1496_v31 = vmul.f32 %v1448_v34, %v3915_v48 }
 0x1a2   : > { %v2503_v9 = vpop.eup %2502  ;;  %v3918_v59 = vmul.f32 %v2501_v14, %v3754_v35  ;;  %2522 = vrcp.f32 %v1314_v45  ;;  %1960 = vperm.xlu1 %2391, %v3804_v58   ;;  %v1464_v20 = vpop.permute.xlu1 %1463  ;;  %v1497_v42 = vmul.f32 %v1448_v34, %v3923_v60  ;;  %v4436_v45 = vld [vmem:[#allocation21_spill] sm:$0xff] }
 0x1a3   : > { %v2505_v40 = vpop.eup %2504  ;;  %v3926_v63 = vmul.f32 %v2503_v9, %v3760_v10  ;;  %2524 = vrcp.f32 %v1315_v23  ;;  %v3934_v10 = vmul.f32 %v3789_v22, %v4435_v37  ;;  %v1460_v14 = vpop.permute.xlu0 %1459 }
 0x1a4   : > { %v2507_v61 = vpop.eup %2506  ;;  %v1494_v50 = vmul.f32 %v1444_v30, %v3918_v59  ;;  %v1318_v35 = vadd.f32 1.0, %v2505_v40  ;;  %2526 = vrcp.f32 %v1321_v62 }
 0x1a5   : > { %v2509_v21 = vpop.eup %2508  ;;  %v1495_v58 = vmul.f32 %v1444_v30, %v3926_v63  ;;  %v1319_v54 = vadd.f32 1.0, %v2507_v61  ;;  %v3942_v30 = vmul.f32 %v3812_v51, %v4436_v45  ;;  %v1500_v51 = vmul.f32 %v1456_v52, %v3934_v10  ;;  %v4437_v61 = vld [vmem:[#allocation22_spill] sm:$0xff] }
 0x1a6   : > { %v2511_v24 = vpop.eup %2510  ;;  %v3937_v27 = vmul.f32 %v2509_v21, %v3780_v49  ;;  %2528 = vrcp.f32 %v1318_v35  ;;  %v1519_v41 = vadd.f32 %v1518_v56, %v1494_v50  ;;  %2392 = vset.pattern.permute.xlu1 %v4356_v29  ;;  %v1472_v1 = vpop.permute.xlu1 %1471  ;;  %v3950_v49 = vld [vmem:[%s4267_s6 + $0x50] sm:$0xff]  ;;  %v3962_v50 = vmul.f32 %v3848_v11, %v4437_v61 }
 0x1a7   : > { %v2513_v53 = vpop.eup %2512  ;;  %v3945_v34 = vmul.f32 %v2511_v24, %v3787_v47  ;;  %2530 = vrcp.f32 %v1319_v54  ;;  %v1540_v22 = vadd.f32 %v1539_v33, %v1495_v58  ;;  %1799 = vperm.xlu1 %2392, %v3950_v49   ;;  %v1501_v32 = vmul.f32 %v1456_v52, %v3942_v30  ;;  %v4438_v54 = vld [vmem:[#allocation10_spill] sm:$0xff]  ;;  %v4439_v52 = vld [vmem:[#allocation32_spill] sm:$0xff] }
 0x1a8   : > { %v2515_v62 = vpop.eup %2514  ;;  %v1498_v23 = vmul.f32 %v1452_v19, %v3937_v27  ;;  %v1520_v9 = vadd.f32 %v1519_v41, %v1496_v31  ;;  %v3980_v41 = vld [vmem:[%s4267_s6 + $0x60] sm:$0xff] }
 0x1a9   : > { %v2517_v28 = vpop.eup %2516  ;;  %v3956_v47 = vmul.f32 %v2515_v62, %v3799_v7  ;;  %v1499_v56 = vmul.f32 %v1452_v19, %v3945_v34  ;;  %v1541_v40 = vadd.f32 %v1540_v22, %v1497_v42  ;;  %v3969_v7 = vmul.f32 %v3864_v16, %v4438_v54 }
 0x1aa   : > { %v2519_v33 = vpop.eup %2518  ;;  %v3965_v35 = vmul.f32 %v2517_v28, %v3809_v43  ;;  %v1521_v31 = vadd.f32 %v1520_v9, %v1498_v23  ;;  %v1480_v21 = vpop.permute.xlu1 %1479  ;;  %v3973_v42 = vmul.f32 %v2513_v53, %v4439_v52  ;;  %v1504_v43 = vmul.f32 %v1464_v20, %v3962_v50 }
 0x1ab   : > { %v2521_v58 = vpop.eup %2520  ;;  %v1542_v24 = vadd.f32 %v1541_v40, %v1499_v56  ;;  %2393 = vset.pattern.permute.xlu1 %v4388_v12  ;;  %v1502_v11 = vmul.f32 %v1460_v14, %v3956_v47  ;;  %v1468_v53 = vpop.permute.xlu0 %1467  ;;  %v1505_v23 = vmul.f32 %v1464_v20, %v3969_v7  ;;  %v3992_v56 = vmul.f32 %v2519_v33, %v3728_v26 }
 0x1ac   : > { %v2523_v19 = vpop.eup %2522  ;;  %v1522_v37 = vadd.f32 %v1521_v31, %v1500_v51  ;;  %1638 = vperm.xlu1 %2393, %v3980_v41   ;;  %v1503_v22 = vmul.f32 %v1460_v14, %v3965_v35  ;;  %v3995_v40 = vmul.f32 %v2521_v58, %v3768_v39 }
 0x1ad   : > { %v2525_v16 = vpop.eup %2524  ;;  %v3984_v45 = vmul.f32 %v2523_v19, %v3821_v44  ;;  %v1543_v62 = vadd.f32 %v1542_v24, %v1501_v32  ;;  %v1508_v44 = vmul.f32 %v1472_v1, %v3973_v42  ;;  %v1509_v58 = vmul.f32 %v1472_v1, %v3992_v56  ;;  %v4010_v19 = vld [vmem:[%s4267_s6 + $0x58] sm:$0xff] }
 0x1ae   : > { %v3989_v9 = vmul.f32 %v2525_v16, %v3827_v4  ;;  %v1523_v51 = vadd.f32 %v1522_v37, %v1502_v11  ;;  %v2527_v28 = vpop.eup %2526  ;;  %v1512_v16 = vmul.f32 %v1480_v21, %v3995_v40 }
 0x1af   : > { %v1544_v61 = vadd.f32 %v1543_v62, %v1503_v22  ;;  %v1591_v31 = vpop.permute.xlu1 %1590  ;;  %v1506_v32 = vmul.f32 %v1468_v53, %v3984_v45  ;;  %v4017_v37 = vmul.f32 %v2527_v28, %v3814_v55 }
 0x1b0   : > { %v2529_v14 = vpop.eup %2528  ;;  %v1524_v54 = vadd.f32 %v1523_v51, %v1504_v43  ;;  %v1653_v20 = vmul.f32 %v1591_v31, %v3832_v38  ;;  %v1654_v4 = vmul.f32 %v1591_v31, %v3836_v5  ;;  %2394 = vset.pattern.permute.xlu1 %v4356_v29  ;;  %v1507_v39 = vmul.f32 %v1468_v53, %v3989_v9 }
 0x1b1   : > { %v2531_v24 = vpop.eup %2530  ;;  %v4003_v26 = vmul.f32 %v2529_v14, %v3844_v6  ;;  %v1545_v33 = vadd.f32 %v1544_v61, %v1505_v23  ;;  %1803 = vperm.xlu1 %2394, %v4010_v19   ;;  %v1476_v6 = vpop.permute.xlu0 %1475  ;;  %v1513_v61 = vmul.f32 %v1480_v21, %v4017_v37  ;;  %v4029_v14 = vld [vmem:[%s4267_s6 + $0x68] sm:$0xff] }
 0x1b2   : > { %v4014_v52 = vmul.f32 %v2531_v24, %v3846_v17  ;;  %v1525_v11 = vadd.f32 %v1524_v54, %v1506_v32  ;;  %v4440_v24 = vld [vmem:[#allocation11_spill] sm:$0xff] }
 0x1b3   : > { %v1546_v43 = vadd.f32 %v1545_v33, %v1507_v39  ;;  %v1595_v22 = vpop.permute.xlu1 %1594  ;;  %v1510_v1 = vmul.f32 %v1476_v6, %v4003_v26 }
 0x1b4   : > { %v1526_v53 = vadd.f32 %v1525_v11, %v1508_v44  ;;  %v1655_v62 = vmul.f32 %v1595_v22, %v3842_v0  ;;  %v1656_v23 = vmul.f32 %v1595_v22, %v3855_v36  ;;  %v1511_v51 = vmul.f32 %v1476_v6, %v4014_v52 }
 0x1b5   : > { %v1547_v17 = vadd.f32 %v1546_v43, %v1509_v58  ;;  %2396 = vset.pattern.permute.xlu1 %v4388_v12 }
 0x1b6   : > { %v1527_v55 = vadd.f32 %v1526_v53, %v1510_v1  ;;  %v1685_v28 = vadd.f32 %v1655_v62, %v1653_v20  ;;  %v1706_v31 = vadd.f32 %v1656_v23, %v1654_v4  ;;  %1642 = vperm.xlu1 %2396, %v4029_v14  }
 0x1b7   : > { %v1548_v44 = vadd.f32 %v1547_v17, %v1511_v51  ;;  %v1599_v32 = vpop.permute.xlu1 %1598 }
 0x1b8   : > { %v1528_v54 = vadd.f32 %v1527_v55, %v1512_v16  ;;  %v1657_v39 = vmul.f32 %v1599_v32, %v4440_v24  ;;  %v1658_v33 = vmul.f32 %v1599_v32, %v3871_v46 }
 0x1b9   : > { %v1549_v21 = vadd.f32 %v1548_v44, %v1513_v61 }
 0x1ba   : > { %v1529_v58 = vrot.slane %v1528_v54, 4  ;;  %v1686_v11 = vadd.f32 %v1685_v28, %v1657_v39  ;;  %v1707_v6 = vadd.f32 %v1706_v31, %v1658_v33  ;;  %2397 = vset.pattern.permute.xlu1 %v4379_v8  ;;  %v2543_v31 = vld [vmem:[%s4267_s6 + $0x70] sm:$0xff]  ;;  %v4050_v33 = vpop.permute.xlu0 %1787 }
 0x1bb   : > { %v1550_v20 = vrot.slane %v1549_v21, 4  ;;  %1972 = vperm.xlu1 %2397, %v4010_v19   ;;  %v1603_v4 = vpop.permute.xlu1 %1602 }
 0x1bc   : > { %v1530_v43 = vadd.f32 %v1529_v58, %v1528_v54  ;;  %v1659_v22 = vmul.f32 %v1603_v4, %v3852_v57  ;;  %v1660_v16 = vmul.f32 %v1603_v4, %v3868_v15  ;;  %v1557_v58 = vstv %s4036_s18  ;;  %v4442_v4 = vld [vmem:[#allocation13_spill] sm:$0xff] }
 0x1bd   : > { %v1551_v1 = vadd.f32 %v1550_v20, %v1549_v21  ;;  %v4441_v20 = vld [vmem:[#allocation17_spill] sm:$0xff] }
 0x1be   : > { %v1531_v53 = vrot.slane %v1530_v43, 2  ;;  %v1687_v62 = vadd.f32 %v1686_v11, %v1659_v22  ;;  %v1708_v23 = vadd.f32 %v1707_v6, %v1660_v16 }
 0x1bf   : > { %v1552_v51 = vrot.slane %v1551_v1, 2  ;;  %2398 = vset.pattern.permute.xlu1 %v4388_v12  ;;  %v1607_v17 = vpop.permute.xlu1 %1606 }
 0x1c0   : > { %v1532_v61 = vadd.f32 %v1531_v53, %v1530_v43  ;;  %v1661_v55 = vmul.f32 %v1607_v17, %v3890_v2  ;;  %v1662_v28 = vmul.f32 %v1607_v17, %v3903_v13  ;;  %1646 = vperm.xlu1 %2398, %v2543_v31   ;;  %v1564_v43 = vrot.slane %v4442_v4, %v4441_v20  ;;  %v4443_v53 = vld [vmem:[#allocation14_spill] sm:$0xff] }
 0x1c1   : > { %v1553_v44 = vadd.f32 %v1552_v51, %v1551_v1 }
 0x1c2   : > { %v1533_v32 = vrot.slane %v1532_v61, 1  ;;  %v4046_v54 = vadd.f32 %v1687_v62, %v1661_v55  ;;  %v4048_v39 = vadd.f32 %v1708_v23, %v1662_v28  ;;  %v4444_v62 = vsub.s32 4, %v4443_v53  ;;  %v4062_v28 = vpop.permute.xlu0 %1791 }
 0x1c3   : > { %v1554_v21 = vrot.slane %v1553_v44, 1 }
 0x1c4   : > { %v1534_v11 = vadd.f32 %v1533_v32, %v1532_v61  ;;  %2399 = vset.pattern.permute.xlu1 %v4379_v8  ;;  %v1760_v6 = vpop.permute.xlu1 %1759  ;;  %v1568_v23 = vrot.slane %v4442_v4, %v4444_v62 }
 0x1c5   : > { %v1555_v22 = vadd.f32 %v1554_v21, %v1553_v44  ;;  %v1822_v16 = vmul.f32 %v1760_v6, %v3832_v38  ;;  %v1823_v1 = vmul.f32 %v1760_v6, %v3836_v5  ;;  %1976 = vperm.xlu1 %2399, %v3980_v41  }
 0x1c6   : > { %v1558_v51 = vadd.f32 %v1557_v58, %v1534_v11 }
 0x1c7   : > { %v1559_v17 = vadd.f32 %v1557_v58, %v1555_v22 }
 0x1c8   : > { %v1571_v61 = vsub.f32 %v1558_v51, %v1564_v43  ;;  %v1764_v55 = vpop.permute.xlu1 %1763 }
 0x1c9   : > { %v1572_v32 = vsub.f32 %v1559_v17, %v1568_v23  ;;  %v1824_v44 = vmul.f32 %v1764_v55, %v3842_v0  ;;  %v1825_v21 = vmul.f32 %v1764_v55, %v3855_v36  ;;  %2401 = vset.pattern.permute.xlu1 %v4356_v29  ;;  %v1929_v17 = vpop.permute.xlu0 %1928 }
 0x1ca   : > { %v1573_v6 = vmul.f32 %v1571_v61, %v1571_v61  ;;  %1815 = vperm.xlu1 %2401, %v2543_v31   ;;  %v1992_v61 = vmul.f32 %v1929_v17, %v3836_v5 }
 0x1cb   : > { %v1574_v20 = vmul.f32 %v1572_v32, %v1572_v32  ;;  %v1854_v62 = vadd.f32 %v1824_v44, %v1822_v16  ;;  %v1875_v53 = vadd.f32 %v1825_v21, %v1823_v1  ;;  %v1991_v1 = vmul.f32 %v1929_v17, %v3832_v38 }
 0x1cc   : > { %v1576_v11 = vsel %vm1575_vm0, %v1573_v6, 0.0  ;;  %v1768_v58 = vpop.permute.xlu1 %1767 }
 0x1cd   : > { %v1577_v43 = vsel %vm1575_vm0, %v1574_v20, 0.0  ;;  %v1826_v22 = vmul.f32 %v1768_v58, %v4440_v24  ;;  %v1827_v23 = vmul.f32 %v1768_v58, %v3871_v46 }
 0x1ce   : > { %v1578_v51 = vadd.f32 %v1577_v43, %v1576_v11  ;;  %2402 = vset.pattern.permute.xlu1 %v4379_v8 }
 0x1cf   : > { %v1855_v55 = vadd.f32 %v1854_v62, %v1826_v22  ;;  %v1876_v4 = vadd.f32 %v1875_v53, %v1827_v23  ;;  %1980 = vperm.xlu1 %2402, %v4029_v14   ;;  %v2544_v62 = vld [vmem:[%s4267_s6 + $0x78] sm:$0xff] }
 0x1d0   : > { %1579 = vadd.xlane.f32.xlu0 %v1578_v51 }
 0x1d1   : > { %v1933_v16 = vpop.permute.xlu1 %1932 }
 0x1d2   : > { %v1993_v32 = vmul.f32 %v1933_v16, %v3842_v0  ;;  %v1994_v44 = vmul.f32 %v1933_v16, %v3855_v36 }
 0x1d3   : > { %1984 = vperm.xlu1 %2402, %v2543_v31  }
 0x1d4   : > { %v2023_v21 = vadd.f32 %v1993_v32, %v1991_v1  ;;  %v2044_v6 = vadd.f32 %v1994_v44, %v1992_v61 }
 0x1d6   : > { %v1772_v20 = vpop.permute.xlu1 %1771 }
 0x1d7   : > { %v1828_v11 = vmul.f32 %v1772_v20, %v3852_v57  ;;  %v1829_v53 = vmul.f32 %v1772_v20, %v3868_v15  ;;  %1988 = vperm.xlu1 %2402, %v2544_v62  }
 0x1d9   : > { %v1856_v38 = vadd.f32 %v1855_v55, %v1828_v11  ;;  %v1877_v58 = vadd.f32 %v1876_v4, %v1829_v53 }
 0x1db   : > { %v1937_v5 = vpop.permute.xlu1 %1936 }
 0x1dc   : > { %v1995_v0 = vmul.f32 %v1937_v5, %v4440_v24  ;;  %v1996_v36 = vmul.f32 %v1937_v5, %v3871_v46 }
 0x1de   : > { %v2024_v31 = vadd.f32 %v2023_v21, %v1995_v0  ;;  %v2045_v43 = vadd.f32 %v2044_v6, %v1996_v36 }
 0x1e0   : > { %v1611_v22 = vpop.permute.xlu1 %1610 }
 0x1e1   : > { %v1663_v23 = vmul.f32 %v1611_v22, %v3896_v25  ;;  %v1664_v51 = vmul.f32 %v1611_v22, %v3900_v18 }
 0x1e3   : > { %v4087_v17 = vadd.f32 %v4046_v54, %v1663_v23  ;;  %v4090_v16 = vadd.f32 %v4048_v39, %v1664_v51 }
 0x1e5   : > { %v1776_v55 = vpop.permute.xlu1 %1775 }
 0x1e6   : > { %1964 = vperm.xlu0 %2388, %v3877_v3   ;;  %v1830_v24 = vmul.f32 %v1776_v55, %v3890_v2  ;;  %v1831_v46 = vmul.f32 %v1776_v55, %v3903_v13 }
 0x1e8   : > { %v1857_v4 = vadd.f32 %v1856_v38, %v1830_v24  ;;  %v1878_v1 = vadd.f32 %v1877_v58, %v1831_v46 }
 0x1ea   : > { %1968 = vperm.xlu0 %2388, %v3950_v49   ;;  %v1941_v61 = vpop.permute.xlu1 %1940 }
 0x1eb   : > { %v1997_v32 = vmul.f32 %v1941_v61, %v3852_v57  ;;  %v1998_v54 = vmul.f32 %v1941_v61, %v3868_v15 }
 0x1ed   : > { %v2025_v44 = vadd.f32 %v2024_v31, %v1997_v32  ;;  %v2046_v21 = vadd.f32 %v2045_v43, %v1998_v54  ;;  %v1949_v31 = vpop.permute.xlu0 %1948 }
 0x1ee   : > { %2395 = vset.pattern.permute.xlu0 %v4388_v12 }
 0x1ef   : > { %1630 = vperm.xlu0 %2395, %v3950_v49   ;;  %v1615_v3 = vpop.permute.xlu1 %1614 }
 0x1f3   : > { %1634 = vperm.xlu0 %2395, %v4010_v19  }
 0x1f4   : > { %v1780_v39 = vpop.permute.xlu1 %1779 }
 0x1f5   : > { %v1832_v6 = vmul.f32 %v1780_v39, %v3896_v25  ;;  %v1833_v20 = vmul.f32 %v1780_v39, %v3900_v18 }
 0x1f7   : > { %1650 = vperm.xlu0 %2395, %v2544_v62   ;;  %v1858_v11 = vadd.f32 %v1857_v4, %v1832_v6  ;;  %v1879_v53 = vadd.f32 %v1878_v1, %v1833_v20  ;;  %v2001_v4 = vmul.f32 %v1949_v31, %v3896_v25  ;;  %v1665_v25 = vmul.f32 %v1615_v3, %v3918_v59 }
 0x1f9   : > { %v1945_v57 = vpop.permute.xlu1 %1944 }
 0x1fa   : > { %v1999_v43 = vmul.f32 %v1945_v57, %v3890_v2  ;;  %v2000_v23 = vmul.f32 %v1945_v57, %v3903_v13  ;;  %v2002_v2 = vmul.f32 %v1949_v31, %v3900_v18  ;;  %v1836_v13 = vmul.f32 %v4050_v33, %v3915_v48 }
 0x1fb   : > { %2400 = vset.pattern.permute.xlu0 %v4356_v29 }
 0x1fc   : > { %1807 = vperm.xlu0 %2400, %v3980_v41   ;;  %v2026_v51 = vadd.f32 %v2025_v44, %v1999_v43  ;;  %v2047_v24 = vadd.f32 %v2046_v21, %v2000_v23  ;;  %v1666_v43 = vmul.f32 %v1615_v3, %v3926_v63 }
 0x1fe   : > { %v1619_v12 = vpop.permute.xlu1 %1618  ;;  %v2027_v44 = vadd.f32 %v2026_v51, %v2001_v4  ;;  %v2048_v20 = vadd.f32 %v2047_v24, %v2002_v2  ;;  %v1837_v51 = vmul.f32 %v4050_v33, %v3923_v60 }
 0x1ff   : > { %v1668_v24 = vmul.f32 %v1619_v12, %v3923_v60 }
 0x200   : > { %1811 = vperm.xlu0 %2400, %v4029_v14  }
 0x203   : > { %v1784_v15 = vpop.permute.xlu1 %1783 }
 0x204   : > { %1819 = vperm.xlu0 %2400, %v2544_v62   ;;  %v1834_v1 = vmul.f32 %v1784_v15, %v3918_v59  ;;  %v1835_v61 = vmul.f32 %v1784_v15, %v3926_v63 }
 0x206   : > { %v1859_v23 = vadd.f32 %v1858_v11, %v1834_v1  ;;  %v1690_v1 = vadd.f32 %v4087_v17, %v1665_v25 }
 0x208   : > { %2403 = vset.pattern.permute.xlu0 %v4379_v8  ;;  %v4107_v49 = vpop.permute.xlu1 %1622 }
 0x20d   : > { %v1953_v19 = vpop.permute.xlu1 %1952 }
 0x20e   : > { %v2003_v32 = vmul.f32 %v1953_v19, %v3918_v59  ;;  %v2004_v39 = vmul.f32 %v1953_v19, %v3926_v63  ;;  %v1667_v59 = vmul.f32 %v1619_v12, %v3915_v48  ;;  %v1839_v12 = vmul.f32 %v4062_v28, %v3945_v34 }
 0x210   : > { %v2028_v18 = vadd.f32 %v2027_v44, %v2003_v32  ;;  %v2049_v31 = vadd.f32 %v2048_v20, %v2004_v39 }
 0x212   : > { %v4109_v38 = vpop.permute.xlu1 %1626 }
 0x217   : > { %v1957_v58 = vpop.permute.xlu1 %1956 }
 0x218   : > { %v2005_v21 = vmul.f32 %v1957_v58, %v3915_v48  ;;  %v2006_v57 = vmul.f32 %v1957_v58, %v3923_v60  ;;  %v1838_v60 = vmul.f32 %v4062_v28, %v3937_v27 }
 0x21a   : > { %v2029_v58 = vadd.f32 %v2028_v18, %v2005_v21  ;;  %v2050_v63 = vadd.f32 %v2049_v31, %v2006_v57 }
 0x21c   : > { %v4111_v5 = vpop.permute.xlu1 %1795 }
 0x221   : > { %v1961_v0 = vpop.permute.xlu1 %1960 }
 0x222   : > { %v2007_v19 = vmul.f32 %v1961_v0, %v3937_v27 }
 0x224   : > { %v2030_v33 = vadd.f32 %v2029_v58, %v2007_v19  ;;  %v1671_v19 = vmul.f32 %v4109_v38, %v3934_v10 }
 0x226   : > { %v4113_v29 = vpop.permute.xlu1 %1799 }
 0x22b   : > { %v4115_v41 = vpop.permute.xlu1 %1638 }
 0x230   : > { %v4117_v36 = vpop.permute.xlu1 %1803 }
 0x235   : > { %v4119_v14 = vpop.permute.xlu1 %1642 }
 0x23a   : > { %v4121_v62 = vpop.permute.xlu1 %1972 }
 0x23b   : > { %v2013_v28 = vmul.f32 %v4121_v62, %v3962_v50 }
 0x23f   : > { %v4123_v8 = vpop.permute.xlu1 %1646 }
 0x244   : > { %v4126_v22 = vpop.permute.xlu1 %1976 }
 0x249   : > { %v4133_v54 = vpop.permute.xlu1 %1815 }
 0x24a   : > { %4445 = vst [vmem:[#allocation47_spill] sm:$0xff] %v4133_v54  ;;  %v1880_v54 = vadd.f32 %v1879_v53, %v1835_v61  ;;  %v1860_v61 = vadd.f32 %v1859_v23, %v1836_v13  ;;  %v1670_v13 = vmul.f32 %v4107_v49, %v3945_v34  ;;  %v2014_v23 = vmul.f32 %v4121_v62, %v3969_v7 }
 0x24b   : > { %v2016_v62 = vmul.f32 %v4126_v22, %v3989_v9 }
 0x24c   : > { %v1881_v32 = vadd.f32 %v1880_v54, %v1837_v51  ;;  %v1669_v54 = vmul.f32 %v4107_v49, %v3937_v27  ;;  %v1861_v25 = vadd.f32 %v1860_v61, %v1838_v60  ;;  %v1672_v27 = vmul.f32 %v4109_v38, %v3942_v30 }
 0x24d   : > { %v1841_v49 = vmul.f32 %v4111_v5, %v3942_v30 }
 0x24e   : > { %v1981_v4 = vpop.permute.xlu1 %1980 }
 0x25d   : > { %v1580_v55 = vpop.xlane.xlu0 %1579 }
 0x25e   : > { %v1581_v46 = vrot.slane %v1580_v55, 4 }
 0x260   : > { %v1582_v6 = vadd.f32 %v1581_v46, %v1580_v55  ;;  %v2008_v55 = vmul.f32 %v1961_v0, %v3945_v34  ;;  %v1711_v0 = vadd.f32 %v4090_v16, %v1666_v43  ;;  %v1985_v43 = vpop.permute.xlu1 %1984  ;;  %v1840_v34 = vmul.f32 %v4111_v5, %v3934_v10 }
 0x261   : > { %v2020_v61 = vmul.f32 %v1985_v43, %v4014_v52 }
 0x262   : > { %v1583_v15 = vrot.slane %v1582_v6, 2  ;;  %v2051_v39 = vadd.f32 %v2050_v63, %v2008_v55  ;;  %v1712_v44 = vadd.f32 %v1711_v0, %v1668_v24  ;;  %v2015_v55 = vmul.f32 %v4126_v22, %v3984_v45 }
 0x263   : > { %v2018_v63 = vmul.f32 %v1981_v4, %v3992_v56  ;;  %v2019_v0 = vmul.f32 %v1985_v43, %v4003_v26 }
 0x264   : > { %v1584_v46 = vadd.f32 %v1583_v15, %v1582_v6  ;;  %v1691_v6 = vadd.f32 %v1690_v1, %v1667_v59  ;;  %v1882_v15 = vadd.f32 %v1881_v32, %v1839_v12  ;;  %v1713_v58 = vadd.f32 %v1712_v44, %v1670_v13  ;;  %v1989_v22 = vpop.permute.xlu1 %1988 }
 0x265   : > { %v1965_v2 = vpop.permute.xlu0 %1964  ;;  %v2022_v44 = vmul.f32 %v1989_v22, %v4017_v37  ;;  %v1842_v13 = vmul.f32 %v4113_v29, %v3956_v47 }
 0x266   : > { %v2009_v3 = vmul.f32 %v1965_v2, %v3934_v10  ;;  %v2010_v11 = vmul.f32 %v1965_v2, %v3942_v30  ;;  %v1585_v53 = vrot.slane %v1584_v46, 1  ;;  %v1692_v24 = vadd.f32 %v1691_v6, %v1669_v54 }
 0x267   : > { %v2017_v10 = vmul.f32 %v1981_v4, %v3973_v42  ;;  %v1883_v1 = vadd.f32 %v1882_v15, %v1841_v49  ;;  %v2021_v6 = vmul.f32 %v1989_v22, %v3995_v40 }
 0x268   : > { %v1586_v48 = vadd.f32 %v1585_v53, %v1584_v46  ;;  %v2031_v20 = vadd.f32 %v2030_v33, %v2009_v3  ;;  %v2052_v57 = vadd.f32 %v2051_v39, %v2010_v11  ;;  %v1693_v3 = vadd.f32 %v1692_v24, %v1671_v19 }
 0x269   : > { %v1969_v21 = vpop.permute.xlu0 %1968  ;;  %v1714_v11 = vadd.f32 %v1713_v58, %v1672_v27  ;;  %v1862_v53 = vadd.f32 %v1861_v25, %v1840_v34  ;;  %v1843_v25 = vmul.f32 %v4113_v29, %v3965_v35  ;;  %v1844_v19 = vmul.f32 %v4117_v36, %v3962_v50 }
 0x26a   : > { %v2011_v17 = vmul.f32 %v1969_v21, %v3956_v47  ;;  %v2012_v16 = vmul.f32 %v1969_v21, %v3965_v35  ;;  %2288 = vpush %v1586_v48  ;;  %v1681_v27 = vmul.f32 %v4123_v8, %v4003_v26  ;;  %v1682_v34 = vmul.f32 %v4123_v8, %v4014_v52 }
 0x26c   : > { %v2032_v18 = vadd.f32 %v2031_v20, %v2011_v17  ;;  %v2053_v31 = vadd.f32 %v2052_v57, %v2012_v16  ;;  %v1677_v57 = vmul.f32 %v4115_v41, %v3984_v45  ;;  %v1678_v17 = vmul.f32 %v4115_v41, %v3989_v9 }
 0x26e   : > { %v2033_v46 = vadd.f32 %v2032_v18, %v2013_v28  ;;  %v2054_v51 = vadd.f32 %v2053_v31, %v2014_v23  ;;  %v1631_v59 = vpop.permute.xlu0 %1630  ;;  %v1679_v23 = vmul.f32 %v4119_v14, %v3973_v42  ;;  %v1680_v18 = vmul.f32 %v4119_v14, %v3992_v56 }
 0x26f   : > { %v1673_v2 = vmul.f32 %v1631_v59, %v3956_v47  ;;  %v1674_v38 = vmul.f32 %v1631_v59, %v3965_v35  ;;  %v1845_v47 = vmul.f32 %v4117_v36, %v3969_v7  ;;  %v1884_v14 = vadd.f32 %v1883_v1, %v1843_v25  ;;  %v4449_v25 = vld [vmem:[#allocation14_spill] sm:$0xff] }
 0x270   : > { %v2034_v30 = vadd.f32 %v2033_v46, %v2015_v55  ;;  %v2055_v5 = vadd.f32 %v2054_v51, %v2016_v62  ;;  %v1863_v62 = vadd.f32 %v1862_v53, %v1842_v13  ;;  %v2066_v53 = vstv %s4197_s23 }
 0x271   : > { %v1694_v48 = vadd.f32 %v1693_v3, %v1673_v2  ;;  %v1715_v60 = vadd.f32 %v1714_v11, %v1674_v38 }
 0x272   : > { %v2035_v32 = vadd.f32 %v2034_v30, %v2017_v10  ;;  %v2056_v33 = vadd.f32 %v2055_v5, %v2018_v63  ;;  %v1635_v39 = vpop.permute.xlu0 %1634  ;;  %v1864_v10 = vadd.f32 %v1863_v62, %v1844_v19  ;;  %v1885_v63 = vadd.f32 %v1884_v14, %v1845_v47 }
 0x273   : > { %v1675_v12 = vmul.f32 %v1635_v39, %v3962_v50  ;;  %v1676_v4 = vmul.f32 %v1635_v39, %v3969_v7 }
 0x274   : > { %v2036_v21 = vadd.f32 %v2035_v32, %v2019_v0  ;;  %v2057_v20 = vadd.f32 %v2056_v33, %v2020_v61 }
 0x275   : > { %v1695_v16 = vadd.f32 %v1694_v48, %v1675_v12  ;;  %v1716_v54 = vadd.f32 %v1715_v60, %v1676_v4  ;;  %v4446_v48 = vld [vmem:[#allocation47_spill] sm:$0xff] }
 0x276   : > { %v2037_v15 = vadd.f32 %v2036_v21, %v2021_v6  ;;  %v2058_v43 = vadd.f32 %v2057_v20, %v2022_v44  ;;  %v1651_v28 = vpop.permute.xlu0 %1650  ;;  %v1850_v60 = vmul.f32 %v4446_v48, %v4003_v26  ;;  %v1851_v12 = vmul.f32 %v4446_v48, %v4014_v52 }
 0x277   : > { %v1696_v41 = vadd.f32 %v1695_v16, %v1677_v57  ;;  %v1717_v31 = vadd.f32 %v1716_v54, %v1678_v17  ;;  %v1683_v24 = vmul.f32 %v1651_v28, %v3995_v40  ;;  %v1684_v7 = vmul.f32 %v1651_v28, %v4017_v37  ;;  %v4447_v54 = vld [vmem:[#allocation24_spill] sm:$0xff] }
 0x278   : > { %v2038_v35 = vrot.slane %v2037_v15, 4  ;;  %v2059_v29 = vrot.slane %v2058_v43, 4 }
 0x279   : > { %v1697_v49 = vadd.f32 %v1696_v41, %v1679_v23  ;;  %v1718_v55 = vadd.f32 %v1717_v31, %v1680_v18 }
 0x27a   : > { %v2039_v46 = vadd.f32 %v2038_v35, %v2037_v15  ;;  %v2060_v51 = vadd.f32 %v2059_v29, %v2058_v43  ;;  %v4450_v15 = vsub.s32 7, %v4449_v25  ;;  %v1728_v29 = vstv %s4215_s27 }
 0x27b   : > { %v1698_v59 = vadd.f32 %v1697_v49, %v1681_v27  ;;  %v1719_v50 = vadd.f32 %v1718_v55, %v1682_v34  ;;  %v1808_v36 = vpop.permute.xlu0 %1807 }
 0x27c   : > { %v1846_v58 = vmul.f32 %v1808_v36, %v3984_v45  ;;  %v1847_v2 = vmul.f32 %v1808_v36, %v3989_v9  ;;  %v2040_v38 = vrot.slane %v2039_v46, 2  ;;  %v2061_v8 = vrot.slane %v2060_v51, 2 }
 0x27d   : > { %v1699_v30 = vadd.f32 %v1698_v59, %v1683_v24  ;;  %v1720_v5 = vadd.f32 %v1719_v50, %v1684_v7 }
 0x27e   : > { %v2041_v3 = vadd.f32 %v2040_v38, %v2039_v46  ;;  %v2062_v11 = vadd.f32 %v2061_v8, %v2060_v51  ;;  %v1865_v0 = vadd.f32 %v1864_v10, %v1846_v58  ;;  %v1886_v61 = vadd.f32 %v1885_v63, %v1847_v2  ;;  %v4451_v46 = vld [vmem:[#allocation20_spill] sm:$0xff] }
 0x27f   : > { %v1700_v1 = vrot.slane %v1699_v30, 4  ;;  %v1721_v22 = vrot.slane %v1720_v5, 4  ;;  %v1812_v32 = vpop.permute.xlu0 %1811 }
 0x280   : > { %v1848_v45 = vmul.f32 %v1812_v32, %v3973_v42  ;;  %v1849_v9 = vmul.f32 %v1812_v32, %v3992_v56  ;;  %v2042_v33 = vrot.slane %v2041_v3, 1  ;;  %v2063_v39 = vrot.slane %v2062_v11, 1  ;;  %v4448_v56 = vld [vmem:[#allocation13_spill] sm:$0xff] }
 0x281   : > { %v1701_v4 = vadd.f32 %v1700_v1, %v1699_v30  ;;  %v1722_v6 = vadd.f32 %v1721_v22, %v1720_v5  ;;  %v2072_v13 = vrot.slane %v4448_v56, %v4447_v54  ;;  %v2076_v26 = vrot.slane %v4448_v56, %v4450_v15 }
 0x282   : > { %v1866_v44 = vadd.f32 %v1865_v0, %v1848_v45  ;;  %v1887_v21 = vadd.f32 %v1886_v61, %v1849_v9  ;;  %v2043_v20 = vadd.f32 %v2042_v33, %v2041_v3  ;;  %v2064_v57 = vadd.f32 %v2063_v39, %v2062_v11  ;;  %v4453_v39 = vld [vmem:[#allocation23_spill] sm:$0xff] }
 0x283   : > { %v1702_v17 = vrot.slane %v1701_v4, 2  ;;  %v1723_v16 = vrot.slane %v1722_v6, 2  ;;  %v1820_v42 = vpop.permute.xlu0 %1819  ;;  %v1734_v51 = vrot.slane %v4448_v56, %v4451_v46  ;;  %v1897_v33 = vstv %s2281_s28 }
 0x284   : > { %v1867_v43 = vadd.f32 %v1866_v44, %v1850_v60  ;;  %v1888_v28 = vadd.f32 %v1887_v21, %v1851_v12  ;;  %v1852_v52 = vmul.f32 %v1820_v42, %v3995_v40  ;;  %v1853_v23 = vmul.f32 %v1820_v42, %v4017_v37 }
 0x285   : > { %v1703_v18 = vadd.f32 %v1702_v17, %v1701_v4  ;;  %v1724_v41 = vadd.f32 %v1723_v16, %v1722_v6  ;;  %v2067_v31 = vadd.f32 %v2066_v53, %v2043_v20  ;;  %v2068_v19 = vadd.f32 %v2066_v53, %v2064_v57 }
 0x286   : > { %v1868_v47 = vadd.f32 %v1867_v43, %v1852_v52  ;;  %v1889_v35 = vadd.f32 %v1888_v28, %v1853_v23  ;;  %v4452_v40 = vsub.s32 5, %v4449_v25  ;;  %v1903_v48 = vrot.slane %v4448_v56, %v4453_v39 }
 0x287   : > { %v1704_v27 = vrot.slane %v1703_v18, 1  ;;  %v1725_v34 = vrot.slane %v1724_v41, 1  ;;  %v2079_v49 = vsub.f32 %v2067_v31, %v2072_v13  ;;  %v2080_v55 = vsub.f32 %v2068_v19, %v2076_v26 }
 0x288   : > { %v1869_v62 = vrot.slane %v1868_v47, 4  ;;  %v1890_v14 = vrot.slane %v1889_v35, 4  ;;  %v1738_v37 = vrot.slane %v4448_v56, %v4452_v40  ;;  %v4454_v6 = vsub.s32 6, %v4449_v25 }
 0x289   : > { %v1705_v59 = vadd.f32 %v1704_v27, %v1703_v18  ;;  %v1726_v50 = vadd.f32 %v1725_v34, %v1724_v41  ;;  %v2081_v24 = vmul.f32 %v2079_v49, %v2079_v49  ;;  %v2082_v7 = vmul.f32 %v2080_v55, %v2080_v55 }
 0x28a   : > { %v1870_v36 = vadd.f32 %v1869_v62, %v1868_v47  ;;  %v1891_v58 = vadd.f32 %v1890_v14, %v1889_v35  ;;  %v1907_v44 = vrot.slane %v4448_v56, %v4454_v6 }
 0x28b   : > { %v1729_v2 = vadd.f32 %v1728_v29, %v1705_v59  ;;  %v1730_v38 = vadd.f32 %v1728_v29, %v1726_v50  ;;  %v2083_v8 = vsel %vm1575_vm0, %v2081_v24, 0.0  ;;  %v2084_v10 = vsel %vm1575_vm0, %v2082_v7, 0.0 }
 0x28c   : > { %v1871_v63 = vrot.slane %v1870_v36, 2  ;;  %v1892_v30 = vrot.slane %v1891_v58, 2  ;;  %v2085_v5 = vadd.f32 %v2084_v10, %v2083_v8 }
 0x28d   : > { %v1741_v3 = vsub.f32 %v1729_v2, %v1734_v51  ;;  %v1742_v11 = vsub.f32 %v1730_v38, %v1738_v37 }
 0x28e   : > { %v1872_v53 = vadd.f32 %v1871_v63, %v1870_v36  ;;  %v1893_v1 = vadd.f32 %v1892_v30, %v1891_v58 }
 0x28f   : > { %v1743_v22 = vmul.f32 %v1741_v3, %v1741_v3  ;;  %v1744_v0 = vmul.f32 %v1742_v11, %v1742_v11 }
 0x290   : > { %v1873_v61 = vrot.slane %v1872_v53, 1  ;;  %v1894_v32 = vrot.slane %v1893_v1, 1 }
 0x291   : > { %v1745_v45 = vsel %vm1575_vm0, %v1743_v22, 0.0  ;;  %v1746_v9 = vsel %vm1575_vm0, %v1744_v0, 0.0 }
 0x292   : > { %v1874_v60 = vadd.f32 %v1873_v61, %v1872_v53  ;;  %v1895_v12 = vadd.f32 %v1894_v32, %v1893_v1  ;;  %v1747_v4 = vadd.f32 %v1746_v9, %v1745_v45 }
 0x294   : > { %1748 = vadd.xlane.f32.xlu0 %v1747_v4  ;;  %v1898_v21 = vadd.f32 %v1897_v33, %v1874_v60  ;;  %v1899_v20 = vadd.f32 %v1897_v33, %v1895_v12 }
 0x296   : > { %v1910_v57 = vsub.f32 %v1898_v21, %v1903_v48  ;;  %v1911_v17 = vsub.f32 %v1899_v20, %v1907_v44 }
 0x298   : > { %2086 = vadd.xlane.f32.xlu0 %v2085_v5  ;;  %v1912_v16 = vmul.f32 %v1910_v57, %v1910_v57  ;;  %v1913_v42 = vmul.f32 %v1911_v17, %v1911_v17 }
 0x29a   : > { %v1914_v54 = vsel %vm1575_vm0, %v1912_v16, 0.0  ;;  %v1915_v13 = vsel %vm1575_vm0, %v1913_v42, 0.0 }
 0x29b   : > { %v1916_v15 = vadd.f32 %v1915_v13, %v1914_v54  ;;  %s2289_s29 = spop %2288 }
 0x29d   : > { %1917 = vadd.xlane.f32.xlu1 %v1916_v15 }
 0x321   : > { %v1749_v26 = vpop.xlane.xlu0 %1748 }
 0x322   : > { %v1750_v43 = vrot.slane %v1749_v26, 4 }
 0x324   : > { %v1751_v28 = vadd.f32 %v1750_v43, %v1749_v26 }
 0x325   : > { %v2087_v25 = vpop.xlane.xlu0 %2086 }
 0x326   : > { %v1752_v52 = vrot.slane %v1751_v28, 2  ;;  %v2088_v56 = vrot.slane %v2087_v25, 4 }
 0x328   : > { %v2089_v23 = vadd.f32 %v2088_v56, %v2087_v25  ;;  %v1753_v18 = vadd.f32 %v1752_v52, %v1751_v28 }
 0x32a   : > { %v2090_v41 = vrot.slane %v2089_v23, 2  ;;  %v1918_v31 = vpop.xlane.xlu1 %1917  ;;  %v1754_v19 = vrot.slane %v1753_v18, 1 }
 0x32b   : > { %v1919_v47 = vrot.slane %v1918_v31, 4 }
 0x32c   : > { %v1755_v35 = vadd.f32 %v1754_v19, %v1753_v18  ;;  %v2091_v27 = vadd.f32 %v2090_v41, %v2089_v23 }
 0x32d   : > { %v1920_v29 = vadd.f32 %v1919_v47, %v1918_v31 }
 0x32e   : > { %2290 = vpush %v1755_v35  ;;  %v2092_v55 = vrot.slane %v2091_v27, 1 }
 0x32f   : > { %v1921_v34 = vrot.slane %v1920_v29, 2 }
 0x330   : > { %v2093_v46 = vadd.f32 %v2092_v55, %v2091_v27 }
 0x331   : > { %v1922_v49 = vadd.f32 %v1921_v34, %v1920_v29 }
 0x333   : > { %v1923_v62 = vrot.slane %v1922_v49, 1 }
 0x335   : > { %v1924_v14 = vadd.f32 %v1923_v62, %v1922_v49 }
 0x337   : > { %2292 = vpush %v1924_v14 }
 0x338   : > { %2294 = vpush %v2093_v46 }
 0x35f   : > { %s2291_s30 = spop %2290 }
 0x360   : > { %s1757_s9 = sadd.f32 %s2291_s30, %s2289_s29 }
 0x368   : > { %s2293_s8 = spop %2292 }
 0x369   : > { %s1926_s12 = sadd.f32 %s2293_s8, %s1757_s9  ;;  %s2295_s13 = spop %2294 }
 0x36b   : > { %s2095_s16 = sadd.f32 %s2295_s13, %s1926_s12 }
 0x36d   : > { %v2096_v51 = vstv %s2095_s16 }
 0x36e   : > { %2097 = vst [vmem:[%s405_s24] sm:$0x1] %v2096_v51 }
 0x36f PF: > { %s19_s26 = sadd.s32 1, %s2620_s26   ;;  %s4455_s24 = smov %s2616_s25 }
 0x370   : > { %p16_p5 = scmp.ge.s32.totalorder %s19_s26, 4   ;;  %s4456_s25 = smov %s4458_s10 }
 0x372   :  { %18 = sbr.rel (!%p16_p5) target bundleno = 3 (0x3), region = 97 }
 0x379   :  { %2121 = vsyncpa [#allocation3], 1 }
 0x37a   :  { %2123 = vsyncpa [#allocation3 + $0x1], 1 }
 0x37b   :  { %2124 = vsyncpa [#allocation5], 1 }

</bundles_post_ra>
